<compile_context>
chip_gen: v7x
topology: tpu7x:2x2x1
jax: 0.10.0
libtpu: 0.0.40
codegen_flags: <defaults>
</compile_context>

<pallas_src>
from typing import NamedTuple

import jax
import jax.numpy as jnp
from jax.experimental import pallas as pl
from jax.experimental.pallas import tpu as pltpu


_SQRT_HALF = 0.7071067811865476  # 1/sqrt(2)
_LN_EPS = 1e-5


# ----------------------------------------------------------------------------
# Kernel
# ----------------------------------------------------------------------------
def _lm_head_kernel(x_ref, w1_ref, b1_ref, g_ref, beta_ref, w2_ref, b2_ref,
                    out_ref, h_ref):
    # --- dense + GELU + LayerNorm: compute once per row tile, cache in VMEM ---
    # (vocab is the innermost grid axis, so program_id(1) == 0 marks the first
    #  visit of this row tile; h_ref persists across the vocab sweep.)
    @pl.when(pl.program_id(1) == 0)
    def _():
        h = jnp.dot(x_ref[...], w1_ref[...], preferred_element_type=jnp.float32)
        h = h + b1_ref[...]                                   # (1, E) broadcast
        # exact (erf) GELU, f32
        h = 0.5 * h * (1.0 + jax.lax.erf(h * jnp.float32(_SQRT_HALF)))
        # LayerNorm over last dim (eps = 1e-5, elementwise affine), f32
        mean = jnp.mean(h, axis=-1, keepdims=True)
        var = jnp.mean(jnp.square(h - mean), axis=-1, keepdims=True)
        h = (h - mean) * jax.lax.rsqrt(var + _LN_EPS)
        h = h * g_ref[...] + beta_ref[...]
        # NOTE: cached in compute_dtype (bf16 in production) before the vocab
        # matmul -- slightly lower precision than an all-f32 reference.
        h_ref[...] = h.astype(h_ref.dtype)

    # --- vocab projection for this (row tile, vocab tile) ---
    logits = jnp.dot(h_ref[...], w2_ref[...], preferred_element_type=jnp.float32)
    out_ref[...] = (logits + b2_ref[...]).astype(out_ref.dtype)


# ----------------------------------------------------------------------------
# Sizing helpers
# ----------------------------------------------------------------------------
def _round_up(x, m):
    return (x + m - 1) // m * m


def _vmem_capacity_bytes(default=64 * 1024 * 1024):
    """Per-core VMEM capacity; conservative 64 MiB fallback if query fails."""
    try:
        info = pltpu.get_tpu_info()
        cap = int(getattr(info, "vmem_capacity_bytes", default))
        return cap if cap > 0 else default
    except Exception:
        return default


def _tile_vmem_bytes(tm, tn, E, compute_dtype, out_dtype,
                     single_buffer_invariants, w2_buffers):
    """Approximate VMEM footprint of one grid step's resident buffers."""
    ci = jnp.dtype(compute_dtype).itemsize
    oi = jnp.dtype(out_dtype).itemsize
    inv = 1 if single_buffer_invariants else 2
    return (2 * tm * E * ci                # activation tile (double-buffered)
            + inv * E * E * ci             # dense weight (grid-invariant)
            + inv * 3 * E * 4              # dense bias + LN gamma/beta (f32)
            + w2_buffers * E * tn * ci     # vocab weight tile (streamed)
            + 2 * tn * 4                   # vocab bias tile
            + 2 * tm * tn * oi             # logits tile (double-buffered)
            + tm * E * ci)                 # cached LN output scratch


def _default_tiles(E, vmem_cap, compute_dtype, out_dtype, w2_buffers):
    """Generation-aware tile defaults, shrunk to fit a VMEM budget."""
    if vmem_cap >= 96 * 1024 * 1024:       # v5e / v6e: 128 MiB VMEM
        tm, tn = 1024, 1024
    else:                                  # v7x: 64 MiB VMEM per TensorCore
        tm, tn = 512, 1024
    budget = int(vmem_cap * 0.75)
    while (_tile_vmem_bytes(tm, tn, E, compute_dtype, out_dtype,
                            False, w2_buffers) > budget
           and (tm > 256 or tn > 512)):
        if tm > 256:
            tm //= 2
        else:
            tn //= 2
    return tm, tn


# ----------------------------------------------------------------------------
# Parameter preparation (do this ONCE at model-load time)
# ----------------------------------------------------------------------------
class LMHeadParams(NamedTuple):
    w1: jax.Array      # (E, E)      compute dtype, transposed to (in, out)
    b1: jax.Array      # (1, E)      f32
    gamma: jax.Array   # (1, E)      f32
    beta: jax.Array    # (1, E)      f32
    w2: jax.Array      # (E, v_pad)  compute dtype, transposed + lane-padded
    b2: jax.Array      # (1, v_pad)  f32
    vocab_size: int
    tn: int
    compute_dtype: jnp.dtype


def prepare_lm_head_params(dense_w, dense_b, ln_g, ln_b, vocab_w, vocab_b, *,
                           tn=None, compute_dtype=jnp.bfloat16,
                           out_dtype=jnp.bfloat16, w2_buffers=2):
    """Transpose / cast / pad the weights once (model-load time)."""
    E = dense_w.shape[0]
    V = vocab_w.shape[0]
    compute_dtype = jnp.dtype(compute_dtype)

    if tn is None:
        _, tn = _default_tiles(E, _vmem_capacity_bytes(), compute_dtype,
                               out_dtype, w2_buffers)
    tn = min(tn, _round_up(V, 128))
    v_pad = _round_up(V, tn)

    w1 = dense_w.T.astype(compute_dtype)                    # (E_in, E_out)
    b1 = dense_b.reshape(1, E).astype(jnp.float32)
    gamma = ln_g.reshape(1, E).astype(jnp.float32)
    beta = ln_b.reshape(1, E).astype(jnp.float32)
    w2 = vocab_w.T.astype(compute_dtype)                    # (E, V)
    b2 = vocab_b.astype(jnp.float32)
    if v_pad != V:
        w2 = jnp.pad(w2, ((0, 0), (0, v_pad - V)))
        b2 = jnp.pad(b2, ((0, v_pad - V),))
    b2 = b2.reshape(1, v_pad)
    return LMHeadParams(w1, b1, gamma, beta, w2, b2, V, int(tn), compute_dtype)


# ----------------------------------------------------------------------------
# pallas_call construction
# ----------------------------------------------------------------------------
def _make_call(n_pad, v_pad, E, tm, tn, compute_dtype, out_dtype,
               vmem_limit_bytes, cost, single_buffer_invariants, w2_buffers):
    def const_spec(shape):
        # Grid-invariant inputs: single-buffer them (index_map is constant).
        if single_buffer_invariants:
            return pl.BlockSpec(shape, lambda i, j: (0, 0),
                                pipeline_mode=pl.Buffered(1))
        return pl.BlockSpec(shape, lambda i, j: (0, 0))

    if w2_buffers != 2:
        w2_spec = pl.BlockSpec((E, tn), lambda i, j: (0, j),
                               pipeline_mode=pl.Buffered(w2_buffers))
    else:
        w2_spec = pl.BlockSpec((E, tn), lambda i, j: (0, j))

    return pl.pallas_call(
        _lm_head_kernel,
        out_shape=jax.ShapeDtypeStruct((n_pad, v_pad), out_dtype),
        grid_spec=pltpu.PrefetchScalarGridSpec(
            num_scalar_prefetch=0,
            grid=(n_pad // tm, v_pad // tn),
            in_specs=[
                pl.BlockSpec((tm, E), lambda i, j: (i, 0)),   # activations
                const_spec((E, E)),                           # dense weight
                const_spec((1, E)),                           # dense bias
                const_spec((1, E)),                           # LN gamma
                const_spec((1, E)),                           # LN beta
                w2_spec,                                       # vocab weight tile
                pl.BlockSpec((1, tn), lambda i, j: (0, j)),   # vocab bias tile
            ],
            out_specs=pl.BlockSpec((tm, tn), lambda i, j: (i, j)),
            scratch_shapes=[pltpu.VMEM((tm, E), compute_dtype)],  # cached LN out
        ),
        compiler_params=pltpu.CompilerParams(
            dimension_semantics=("parallel", "arbitrary"),
            vmem_limit_bytes=int(vmem_limit_bytes),
        ),
        cost_estimate=cost,
    )


def roberta_lm_head_apply(features, params, *, tm=None,
                          out_dtype=jnp.bfloat16, w2_buffers=2):
    """Per-call work only: reshape/row-pad activations and run the kernel.

    out_dtype defaults to bfloat16 to halve the dominant [N, V] logits
    writeback.  TODO(synk): for training, fuse the downstream softmax /
    cross-entropy so full logits are never materialized in HBM.
    """
    B, S, E = features.shape
    N = B * S
    V = params.vocab_size
    v_pad = params.w2.shape[1]
    tn = params.tn
    compute_dtype = params.compute_dtype
    out_dtype = jnp.dtype(out_dtype)

    vmem_cap = _vmem_capacity_bytes()
    if tm is None:
        tm, _ = _default_tiles(E, vmem_cap, compute_dtype, out_dtype, w2_buffers)
    tm = min(tm, _round_up(N, 16))
    # v7x-like config: 2 TensorCores split the "parallel" row axis -- keep at
    # least 2 row tiles so neither core sits idle.
    if vmem_cap <= 64 * 1024 * 1024 and N >= 32:
        tm = min(tm, _round_up((N + 1) // 2, 16))
    n_pad = _round_up(N, tm)
    n_row_tiles = n_pad // tm

    x2d = features.reshape(N, E).astype(compute_dtype)
    if n_pad != N:
        # Padded rows flow through LN with var=0 -> finite (beta); sliced off.
        x2d = jnp.pad(x2d, ((0, n_pad - N), (0, 0)))

    # VMEM limit from the actual tile footprint (upper-bound: double-buffered
    # invariants), capped below physical capacity so the compiler keeps
    # headroom for its own scratch / semaphores.
    footprint = _tile_vmem_bytes(tm, tn, E, compute_dtype, out_dtype,
                                 False, max(w2_buffers, 2))
    vmem_limit = min(max(footprint + (8 << 20), 32 << 20),
                     int(vmem_cap * 0.85))

    ci = jnp.dtype(compute_dtype).itemsize
    cost = pl.CostEstimate(
        flops=int(2 * n_pad * E * E + 2 * n_pad * E * v_pad),
        transcendentals=int(n_pad * E),
        bytes_accessed=int(
            n_pad * E * ci                                  # activations
            + E * E * ci + 3 * E * 4                        # dense w/b, LN g/b
            + E * v_pad * ci * n_row_tiles                  # w2: once per row tile
            + v_pad * 4 * n_row_tiles                       # vocab bias
            + n_pad * v_pad * jnp.dtype(out_dtype).itemsize),   # logits store
    )

    args = (x2d, params.w1, params.b1, params.gamma, params.beta,
            params.w2, params.b2)
    try:
        call = _make_call(n_pad, v_pad, E, tm, tn, compute_dtype, out_dtype,
                          vmem_limit, cost, True, w2_buffers)
        out = jax.block_until_ready(call(*args))
    except Exception:
        # Fallback: default (double-buffered) pipelining for all inputs.
        call = _make_call(n_pad, v_pad, E, tm, tn, compute_dtype, out_dtype,
                          vmem_limit, cost, False, 2)
        out = jax.block_until_ready(call(*args))

    out = out[:N, :V]
    return out.reshape(B, S, V)


def roberta_lm_head(features, dense_w, dense_b, ln_g, ln_b, vocab_w, vocab_b,
                    *, tm=None, tn=None, compute_dtype=jnp.bfloat16,
                    out_dtype=jnp.bfloat16, w2_buffers=2):
    """Convenience wrapper.  In production call prepare_lm_head_params() once
    at model-load time and roberta_lm_head_apply() per step."""
    params = prepare_lm_head_params(
        dense_w, dense_b, ln_g, ln_b, vocab_w, vocab_b,
        tn=tn, compute_dtype=compute_dtype, out_dtype=out_dtype,
        w2_buffers=w2_buffers)
    return roberta_lm_head_apply(features, params, tm=tm, out_dtype=out_dtype,
                                 w2_buffers=w2_buffers)


# ----------------------------------------------------------------------------
# Pure-JAX reference and self-test
# ----------------------------------------------------------------------------
def _reference(features, dense_w, dense_b, ln_g, ln_b, vocab_w, vocab_b):
    x = features @ dense_w.T + dense_b
    x = 0.5 * x * (1.0 + jax.lax.erf(x / jnp.sqrt(2.0)))
    mean = jnp.mean(x, axis=-1, keepdims=True)
    var = jnp.mean(jnp.square(x - mean), axis=-1, keepdims=True)
    x = (x - mean) * jax.lax.rsqrt(var + _LN_EPS)
    x = x * ln_g + ln_b
    return x @ vocab_w.T + vocab_b


if __name__ == "__main__":
    # Small shapes; N=24 exercises row padding, tn=128 exercises multiple
    # vocab tiles (so the @pl.when-cached prologue is actually reused).
    B, S, E, V = 2, 12, 128, 384

    key = jax.random.PRNGKey(0)
    k_feat, k_w1, k_b1, k_w2 = jax.random.split(key, 4)

    features = jax.random.normal(k_feat, (B, S, E), dtype=jnp.float32)

    dense_w = jax.random.normal(k_w1, (E, E), dtype=jnp.float32) * 0.05   # nn.Linear(E,E).weight
    dense_b = jax.random.normal(k_b1, (E,), dtype=jnp.float32) * 0.01     # nn.Linear(E,E).bias
    ln_g = jnp.ones((E,), dtype=jnp.float32)                              # LayerNorm weight
    ln_b = jnp.zeros((E,), dtype=jnp.float32)                             # LayerNorm bias
    vocab_w = jax.random.normal(k_w2, (V, E), dtype=jnp.float32) * 0.05   # tied embedding weight
    vocab_b = jnp.zeros((V,), dtype=jnp.float32)                          # zeros(V)

    ref = _reference(features, dense_w, dense_b, ln_g, ln_b, vocab_w, vocab_b)

    # 1) f32 MXU path: tight numerical check of the kernel structure.
    out_f32 = roberta_lm_head(features, dense_w, dense_b, ln_g, ln_b,
                              vocab_w, vocab_b, tn=128,
                              compute_dtype=jnp.float32,
                              out_dtype=jnp.float32)
    out_f32 = jax.block_until_ready(out_f32)
    assert out_f32.shape == (B, S, V)
    assert jnp.max(jnp.abs(out_f32 - ref)) < 1e-4, "f32 kernel mismatch vs reference"

    # 2) production config: bf16 compute + bf16 logits (looser tolerance).
    params = prepare_lm_head_params(dense_w, dense_b, ln_g, ln_b,
                                    vocab_w, vocab_b, tn=128)
    out_bf16 = roberta_lm_head_apply(features, params)
    out_bf16 = jax.block_until_ready(out_bf16)
    assert out_bf16.shape == (B, S, V)
    assert out_bf16.dtype == jnp.bfloat16
    assert jnp.max(jnp.abs(out_bf16.astype(jnp.float32) - ref)) < 5e-2, \
        "bf16 kernel mismatch vs reference"

    print("KERNEL_OK")
</pallas_src>

<mosaic_0001>
module attributes {stable_mosaic.version = 11 : i64} {
  func.func @_lm_head_kernel(%arg0: i32, %arg1: i32, %arg2: memref<32x128xf32, #tpu.memory_space<vmem>>, %arg3: memref<128x128xf32, #tpu.memory_space<vmem>>, %arg4: memref<1x128xf32, #tpu.memory_space<vmem>>, %arg5: memref<1x128xf32, #tpu.memory_space<vmem>>, %arg6: memref<1x128xf32, #tpu.memory_space<vmem>>, %arg7: memref<128x128xf32, #tpu.memory_space<vmem>>, %arg8: memref<1x128xf32, #tpu.memory_space<vmem>>, %arg9: memref<32x128xf32, #tpu.memory_space<vmem>>, %arg10: memref<32x128xf32, #tpu.memory_space<vmem>>) attributes {dimension_semantics = [#tpu.dimension_semantics<parallel>, #tpu.dimension_semantics<arbitrary>], iteration_bounds = array<i64: 1, 3>, scalar_prefetch = 0 : i64, scratch_operands = 1 : i64, tpu.core_type = #tpu.core_type<tc>, window_params = [{transform_indices = @transform_0, window_bounds = array<i64: 32, 128>}, {pipeline_mode = #tpu.pipeline_mode<synchronous>, transform_indices = @transform_1, window_bounds = array<i64: 128, 128>}, {pipeline_mode = #tpu.pipeline_mode<synchronous>, transform_indices = @transform_2, window_bounds = array<i64: 1, 128>}, {pipeline_mode = #tpu.pipeline_mode<synchronous>, transform_indices = @transform_3, window_bounds = array<i64: 1, 128>}, {pipeline_mode = #tpu.pipeline_mode<synchronous>, transform_indices = @transform_4, window_bounds = array<i64: 1, 128>}, {transform_indices = @transform_5, window_bounds = array<i64: 128, 128>}, {transform_indices = @transform_6, window_bounds = array<i64: 1, 128>}, {transform_indices = @transform_7, window_bounds = array<i64: 32, 128>}]} {
    %c0_i32 = arith.constant 0 : i32
    %0 = arith.cmpi eq, %arg1, %c0_i32 : i32
    %1 = arith.extui %0 : i1 to i32
    %c0_i32_0 = arith.constant 0 : i32
    %2 = arith.cmpi ne, %1, %c0_i32_0 : i32
    scf.if %2 {
      %c0_8 = arith.constant 0 : index
      %c0_9 = arith.constant 0 : index
      %10 = vector.load %arg2[%c0_8, %c0_9] : memref<32x128xf32, #tpu.memory_space<vmem>>, vector<32x128xf32>
      %c0_10 = arith.constant 0 : index
      %c0_11 = arith.constant 0 : index
      %11 = vector.load %arg3[%c0_10, %c0_11] : memref<128x128xf32, #tpu.memory_space<vmem>>, vector<128x128xf32>
      %cst_12 = arith.constant dense<0.000000e+00> : vector<32x128xf32>
      %12 = tpu.matmul %10, %11, %cst_12 {dimension_numbers = #tpu.dot_dimension_numbers<[1], [0], [0], [1], [0, 0, 1, 1], [], []>} : vector<32x128xf32>, vector<128x128xf32>, vector<32x128xf32> -> vector<32x128xf32>
      %c0_13 = arith.constant 0 : index
      %c0_14 = arith.constant 0 : index
      %13 = vector.load %arg4[%c0_13, %c0_14] : memref<1x128xf32, #tpu.memory_space<vmem>>, vector<1x128xf32>
      %14 = vector.broadcast %13 : vector<1x128xf32> to vector<32x128xf32>
      %15 = arith.addf %12, %14 : vector<32x128xf32>
      %cst_15 = arith.constant 5.000000e-01 : f32
      %16 = vector.broadcast %cst_15 : f32 to vector<32x128xf32>
      %17 = arith.mulf %16, %15 : vector<32x128xf32>
      %cst_16 = arith.constant 0.707106769 : f32
      %18 = vector.broadcast %cst_16 : f32 to vector<32x128xf32>
      %19 = arith.mulf %15, %18 : vector<32x128xf32>
      %20 = math.erf %19 : vector<32x128xf32>
      %cst_17 = arith.constant 1.000000e+00 : f32
      %21 = vector.broadcast %cst_17 : f32 to vector<32x128xf32>
      %22 = arith.addf %21, %20 : vector<32x128xf32>
      %23 = arith.mulf %17, %22 : vector<32x128xf32>
      %cst_18 = arith.constant dense<0.000000e+00> : vector<32xf32>
      %24 = vector.multi_reduction <add>, %23, %cst_18 [1] : vector<32x128xf32> to vector<32xf32>
      %25 = vector.shape_cast %24 : vector<32xf32> to vector<32x1xf32>
      %cst_19 = arith.constant 1.280000e+02 : f32
      %26 = vector.broadcast %cst_19 : f32 to vector<32x1xf32>
      %27 = arith.divf %25, %26 : vector<32x1xf32>
      %28 = vector.broadcast %27 : vector<32x1xf32> to vector<32x128xf32>
      %29 = arith.subf %23, %28 : vector<32x128xf32>
      %30 = arith.mulf %29, %29 : vector<32x128xf32>
      %cst_20 = arith.constant dense<0.000000e+00> : vector<32xf32>
      %31 = vector.multi_reduction <add>, %30, %cst_20 [1] : vector<32x128xf32> to vector<32xf32>
      %32 = vector.shape_cast %31 : vector<32xf32> to vector<32x1xf32>
      %cst_21 = arith.constant 1.280000e+02 : f32
      %33 = vector.broadcast %cst_21 : f32 to vector<32x1xf32>
      %34 = arith.divf %32, %33 : vector<32x1xf32>
      %35 = vector.broadcast %27 : vector<32x1xf32> to vector<32x128xf32>
      %36 = arith.subf %23, %35 : vector<32x128xf32>
      %cst_22 = arith.constant 9.99999974E-6 : f32
      %37 = vector.broadcast %cst_22 : f32 to vector<32x1xf32>
      %38 = arith.addf %34, %37 : vector<32x1xf32>
      %39 = math.rsqrt %38 : vector<32x1xf32>
      %40 = vector.broadcast %39 : vector<32x1xf32> to vector<32x128xf32>
      %41 = arith.mulf %36, %40 : vector<32x128xf32>
      %c0_23 = arith.constant 0 : index
      %c0_24 = arith.constant 0 : index
      %42 = vector.load %arg5[%c0_23, %c0_24] : memref<1x128xf32, #tpu.memory_space<vmem>>, vector<1x128xf32>
      %43 = vector.broadcast %42 : vector<1x128xf32> to vector<32x128xf32>
      %44 = arith.mulf %41, %43 : vector<32x128xf32>
      %c0_25 = arith.constant 0 : index
      %c0_26 = arith.constant 0 : index
      %45 = vector.load %arg6[%c0_25, %c0_26] : memref<1x128xf32, #tpu.memory_space<vmem>>, vector<1x128xf32>
      %46 = vector.broadcast %45 : vector<1x128xf32> to vector<32x128xf32>
      %47 = arith.addf %44, %46 : vector<32x128xf32>
      %c0_27 = arith.constant 0 : index
      %c0_28 = arith.constant 0 : index
      %48 = vector.load %arg10[%c0_27, %c0_28] : memref<32x128xf32, #tpu.memory_space<vmem>>, vector<32x128xf32>
      tpu.vector_store %arg10[%c0_27, %c0_28], %47 {strides = array<i32>} : memref<32x128xf32, #tpu.memory_space<vmem>>, vector<32x128xf32>,
    } else {
    }
    %c0 = arith.constant 0 : index
    %c0_1 = arith.constant 0 : index
    %3 = vector.load %arg10[%c0, %c0_1] : memref<32x128xf32, #tpu.memory_space<vmem>>, vector<32x128xf32>
    %c0_2 = arith.constant 0 : index
    %c0_3 = arith.constant 0 : index
    %4 = vector.load %arg7[%c0_2, %c0_3] : memref<128x128xf32, #tpu.memory_space<vmem>>, vector<128x128xf32>
    %cst = arith.constant dense<0.000000e+00> : vector<32x128xf32>
    %5 = tpu.matmul %3, %4, %cst {dimension_numbers = #tpu.dot_dimension_numbers<[1], [0], [0], [1], [0, 0, 1, 1], [], []>} : vector<32x128xf32>, vector<128x128xf32>, vector<32x128xf32> -> vector<32x128xf32>
    %c0_4 = arith.constant 0 : index
    %c0_5 = arith.constant 0 : index
    %6 = vector.load %arg8[%c0_4, %c0_5] : memref<1x128xf32, #tpu.memory_space<vmem>>, vector<1x128xf32>
    %7 = vector.broadcast %6 : vector<1x128xf32> to vector<32x128xf32>
    %8 = arith.addf %5, %7 : vector<32x128xf32>
    %c0_6 = arith.constant 0 : index
    %c0_7 = arith.constant 0 : index
    %9 = vector.load %arg9[%c0_6, %c0_7] : memref<32x128xf32, #tpu.memory_space<vmem>>, vector<32x128xf32>
    tpu.vector_store %arg9[%c0_6, %c0_7], %8 {strides = array<i32>} : memref<32x128xf32, #tpu.memory_space<vmem>>, vector<32x128xf32>,
    return
  }
  func.func @transform_0(%arg0: i32, %arg1: i32) -> (i32, i32) {
    %c0_i32 = arith.constant 0 : i32
    %c0_i32_0 = arith.constant 0 : i32
    return %arg0, %c0_i32 : i32, i32
  }
  func.func @transform_1(%arg0: i32, %arg1: i32) -> (i32, i32) {
    %c0_i32 = arith.constant 0 : i32
    %c0_i32_0 = arith.constant 0 : i32
    %c0_i32_1 = arith.constant 0 : i32
    return %c0_i32, %c0_i32_0 : i32, i32
  }
  func.func @transform_2(%arg0: i32, %arg1: i32) -> (i32, i32) {
    %c0_i32 = arith.constant 0 : i32
    %c0_i32_0 = arith.constant 0 : i32
    %c0_i32_1 = arith.constant 0 : i32
    return %c0_i32, %c0_i32_0 : i32, i32
  }
  func.func @transform_3(%arg0: i32, %arg1: i32) -> (i32, i32) {
    %c0_i32 = arith.constant 0 : i32
    %c0_i32_0 = arith.constant 0 : i32
    %c0_i32_1 = arith.constant 0 : i32
    return %c0_i32, %c0_i32_0 : i32, i32
  }
  func.func @transform_4(%arg0: i32, %arg1: i32) -> (i32, i32) {
    %c0_i32 = arith.constant 0 : i32
    %c0_i32_0 = arith.constant 0 : i32
    %c0_i32_1 = arith.constant 0 : i32
    return %c0_i32, %c0_i32_0 : i32, i32
  }
  func.func @transform_5(%arg0: i32, %arg1: i32) -> (i32, i32) {
    %c0_i32 = arith.constant 0 : i32
    %c0_i32_0 = arith.constant 0 : i32
    return %c0_i32, %arg1 : i32, i32
  }
  func.func @transform_6(%arg0: i32, %arg1: i32) -> (i32, i32) {
    %c0_i32 = arith.constant 0 : i32
    %c0_i32_0 = arith.constant 0 : i32
    return %c0_i32, %arg1 : i32, i32
  }
  func.func @transform_7(%arg0: i32, %arg1: i32) -> (i32, i32) {
    %c0_i32 = arith.constant 0 : i32
    return %arg0, %arg1 : i32, i32
  }
}

module attributes {stable_mosaic.version = 11 : i64} {
  func.func @_lm_head_kernel(%arg0: i32, %arg1: i32, %arg2: memref<32x128xf32, #tpu.memory_space<vmem>>, %arg3: memref<128x128xf32, #tpu.memory_space<vmem>>, %arg4: memref<1x128xf32, #tpu.memory_space<vmem>>, %arg5: memref<1x128xf32, #tpu.memory_space<vmem>>, %arg6: memref<1x128xf32, #tpu.memory_space<vmem>>, %arg7: memref<128x128xf32, #tpu.memory_space<vmem>>, %arg8: memref<1x128xf32, #tpu.memory_space<vmem>>, %arg9: memref<32x128xf32, #tpu.memory_space<vmem>>, %arg10: memref<32x128xf32, #tpu.memory_space<vmem>>) attributes {dimension_semantics = [#tpu.dimension_semantics<parallel>, #tpu.dimension_semantics<arbitrary>], iteration_bounds = array<i64: 1, 3>, scalar_prefetch = 0 : i64, scratch_operands = 1 : i64, tpu.core_type = #tpu.core_type<tc>, window_params = [{transform_indices = @transform_0, window_bounds = array<i64: 32, 128>}, {pipeline_mode = #tpu.pipeline_mode<synchronous>, transform_indices = @transform_1, window_bounds = array<i64: 128, 128>}, {pipeline_mode = #tpu.pipeline_mode<synchronous>, transform_indices = @transform_2, window_bounds = array<i64: 1, 128>}, {pipeline_mode = #tpu.pipeline_mode<synchronous>, transform_indices = @transform_3, window_bounds = array<i64: 1, 128>}, {pipeline_mode = #tpu.pipeline_mode<synchronous>, transform_indices = @transform_4, window_bounds = array<i64: 1, 128>}, {transform_indices = @transform_5, window_bounds = array<i64: 128, 128>}, {transform_indices = @transform_6, window_bounds = array<i64: 1, 128>}, {transform_indices = @transform_7, window_bounds = array<i64: 32, 128>}]} {
    %c0_i32 = arith.constant 0 : i32
    %0 = arith.cmpi eq, %arg1, %c0_i32 : i32
    %1 = arith.extui %0 : i1 to i32
    %c0_i32_0 = arith.constant 0 : i32
    %2 = arith.cmpi ne, %1, %c0_i32_0 : i32
    scf.if %2 {
      %c0_8 = arith.constant 0 : index
      %c0_9 = arith.constant 0 : index
      %10 = vector.load %arg2[%c0_8, %c0_9] : memref<32x128xf32, #tpu.memory_space<vmem>>, vector<32x128xf32>
      %c0_10 = arith.constant 0 : index
      %c0_11 = arith.constant 0 : index
      %11 = vector.load %arg3[%c0_10, %c0_11] : memref<128x128xf32, #tpu.memory_space<vmem>>, vector<128x128xf32>
      %cst_12 = arith.constant dense<0.000000e+00> : vector<32x128xf32>
      %12 = tpu.matmul %10, %11, %cst_12 {dimension_numbers = #tpu.dot_dimension_numbers<[1], [0], [0], [1], [0, 0, 1, 1], [], []>} : vector<32x128xf32>, vector<128x128xf32>, vector<32x128xf32> -> vector<32x128xf32>
      %c0_13 = arith.constant 0 : index
      %c0_14 = arith.constant 0 : index
      %13 = vector.load %arg4[%c0_13, %c0_14] : memref<1x128xf32, #tpu.memory_space<vmem>>, vector<1x128xf32>
      %14 = vector.broadcast %13 : vector<1x128xf32> to vector<32x128xf32>
      %15 = arith.addf %12, %14 : vector<32x128xf32>
      %cst_15 = arith.constant 5.000000e-01 : f32
      %16 = vector.broadcast %cst_15 : f32 to vector<32x128xf32>
      %17 = arith.mulf %16, %15 : vector<32x128xf32>
      %cst_16 = arith.constant 0.707106769 : f32
      %18 = vector.broadcast %cst_16 : f32 to vector<32x128xf32>
      %19 = arith.mulf %15, %18 : vector<32x128xf32>
      %20 = math.erf %19 : vector<32x128xf32>
      %cst_17 = arith.constant 1.000000e+00 : f32
      %21 = vector.broadcast %cst_17 : f32 to vector<32x128xf32>
      %22 = arith.addf %21, %20 : vector<32x128xf32>
      %23 = arith.mulf %17, %22 : vector<32x128xf32>
      %cst_18 = arith.constant dense<0.000000e+00> : vector<32xf32>
      %24 = vector.multi_reduction <add>, %23, %cst_18 [1] : vector<32x128xf32> to vector<32xf32>
      %25 = vector.shape_cast %24 : vector<32xf32> to vector<32x1xf32>
      %cst_19 = arith.constant 1.280000e+02 : f32
      %26 = vector.broadcast %cst_19 : f32 to vector<32x1xf32>
      %27 = arith.divf %25, %26 : vector<32x1xf32>
      %28 = vector.broadcast %27 : vector<32x1xf32> to vector<32x128xf32>
      %29 = arith.subf %23, %28 : vector<32x128xf32>
      %30 = arith.mulf %29, %29 : vector<32x128xf32>
      %cst_20 = arith.constant dense<0.000000e+00> : vector<32xf32>
      %31 = vector.multi_reduction <add>, %30, %cst_20 [1] : vector<32x128xf32> to vector<32xf32>
      %32 = vector.shape_cast %31 : vector<32xf32> to vector<32x1xf32>
      %cst_21 = arith.constant 1.280000e+02 : f32
      %33 = vector.broadcast %cst_21 : f32 to vector<32x1xf32>
      %34 = arith.divf %32, %33 : vector<32x1xf32>
      %35 = vector.broadcast %27 : vector<32x1xf32> to vector<32x128xf32>
      %36 = arith.subf %23, %35 : vector<32x128xf32>
      %cst_22 = arith.constant 9.99999974E-6 : f32
      %37 = vector.broadcast %cst_22 : f32 to vector<32x1xf32>
      %38 = arith.addf %34, %37 : vector<32x1xf32>
      %39 = math.rsqrt %38 : vector<32x1xf32>
      %40 = vector.broadcast %39 : vector<32x1xf32> to vector<32x128xf32>
      %41 = arith.mulf %36, %40 : vector<32x128xf32>
      %c0_23 = arith.constant 0 : index
      %c0_24 = arith.constant 0 : index
      %42 = vector.load %arg5[%c0_23, %c0_24] : memref<1x128xf32, #tpu.memory_space<vmem>>, vector<1x128xf32>
      %43 = vector.broadcast %42 : vector<1x128xf32> to vector<32x128xf32>
      %44 = arith.mulf %41, %43 : vector<32x128xf32>
      %c0_25 = arith.constant 0 : index
      %c0_26 = arith.constant 0 : index
      %45 = vector.load %arg6[%c0_25, %c0_26] : memref<1x128xf32, #tpu.memory_space<vmem>>, vector<1x128xf32>
      %46 = vector.broadcast %45 : vector<1x128xf32> to vector<32x128xf32>
      %47 = arith.addf %44, %46 : vector<32x128xf32>
      %c0_27 = arith.constant 0 : index
      %c0_28 = arith.constant 0 : index
      %48 = vector.load %arg10[%c0_27, %c0_28] : memref<32x128xf32, #tpu.memory_space<vmem>>, vector<32x128xf32>
      tpu.vector_store %arg10[%c0_27, %c0_28], %47 {strides = array<i32>} : memref<32x128xf32, #tpu.memory_space<vmem>>, vector<32x128xf32>,
    } else {
    }
    %c0 = arith.constant 0 : index
    %c0_1 = arith.constant 0 : index
    %3 = vector.load %arg10[%c0, %c0_1] : memref<32x128xf32, #tpu.memory_space<vmem>>, vector<32x128xf32>
    %c0_2 = arith.constant 0 : index
    %c0_3 = arith.constant 0 : index
    %4 = vector.load %arg7[%c0_2, %c0_3] : memref<128x128xf32, #tpu.memory_space<vmem>>, vector<128x128xf32>
    %cst = arith.constant dense<0.000000e+00> : vector<32x128xf32>
    %5 = tpu.matmul %3, %4, %cst {dimension_numbers = #tpu.dot_dimension_numbers<[1], [0], [0], [1], [0, 0, 1, 1], [], []>} : vector<32x128xf32>, vector<128x128xf32>, vector<32x128xf32> -> vector<32x128xf32>
    %c0_4 = arith.constant 0 : index
    %c0_5 = arith.constant 0 : index
    %6 = vector.load %arg8[%c0_4, %c0_5] : memref<1x128xf32, #tpu.memory_space<vmem>>, vector<1x128xf32>
    %7 = vector.broadcast %6 : vector<1x128xf32> to vector<32x128xf32>
    %8 = arith.addf %5, %7 : vector<32x128xf32>
    %c0_6 = arith.constant 0 : index
    %c0_7 = arith.constant 0 : index
    %9 = vector.load %arg9[%c0_6, %c0_7] : memref<32x128xf32, #tpu.memory_space<vmem>>, vector<32x128xf32>
    tpu.vector_store %arg9[%c0_6, %c0_7], %8 {strides = array<i32>} : memref<32x128xf32, #tpu.memory_space<vmem>>, vector<32x128xf32>,
    return
  }
  func.func @transform_0(%arg0: i32, %arg1: i32) -> (i32, i32) {
    %c0_i32 = arith.constant 0 : i32
    %c0_i32_0 = arith.constant 0 : i32
    return %arg0, %c0_i32 : i32, i32
  }
  func.func @transform_1(%arg0: i32, %arg1: i32) -> (i32, i32) {
    %c0_i32 = arith.constant 0 : i32
    %c0_i32_0 = arith.constant 0 : i32
    %c0_i32_1 = arith.constant 0 : i32
    return %c0_i32, %c0_i32_0 : i32, i32
  }
  func.func @transform_2(%arg0: i32, %arg1: i32) -> (i32, i32) {
    %c0_i32 = arith.constant 0 : i32
    %c0_i32_0 = arith.constant 0 : i32
    %c0_i32_1 = arith.constant 0 : i32
    return %c0_i32, %c0_i32_0 : i32, i32
  }
  func.func @transform_3(%arg0: i32, %arg1: i32) -> (i32, i32) {
    %c0_i32 = arith.constant 0 : i32
    %c0_i32_0 = arith.constant 0 : i32
    %c0_i32_1 = arith.constant 0 : i32
    return %c0_i32, %c0_i32_0 : i32, i32
  }
  func.func @transform_4(%arg0: i32, %arg1: i32) -> (i32, i32) {
    %c0_i32 = arith.constant 0 : i32
    %c0_i32_0 = arith.constant 0 : i32
    %c0_i32_1 = arith.constant 0 : i32
    return %c0_i32, %c0_i32_0 : i32, i32
  }
  func.func @transform_5(%arg0: i32, %arg1: i32) -> (i32, i32) {
    %c0_i32 = arith.constant 0 : i32
    %c0_i32_0 = arith.constant 0 : i32
    return %c0_i32, %arg1 : i32, i32
  }
  func.func @transform_6(%arg0: i32, %arg1: i32) -> (i32, i32) {
    %c0_i32 = arith.constant 0 : i32
    %c0_i32_0 = arith.constant 0 : i32
    return %c0_i32, %arg1 : i32, i32
  }
  func.func @transform_7(%arg0: i32, %arg1: i32) -> (i32, i32) {
    %c0_i32 = arith.constant 0 : i32
    return %arg0, %arg1 : i32, i32
  }
}

</mosaic_0001>

<bundles_post_ra>
// kernel: tpu_custom_call.1
= control target key start
LH: loop header
LB: loop body
LE: loop exit
PB: predicated region body
PF: predicated region fallthrough
CT: control target
= control target key end

     0   :  { %12 = vsyncpa [#allocation4], 0  ;;  %s1695_s0 = inlined_call_operand.hbm [shape: f32[32,128], index: 0, kind: input, shape index: {}]   ;;  %s1696_s1 = inlined_call_operand.hbm [shape: f32[128,128], index: 1, kind: input, shape index: {}]   ;;  %s1697_s2 = inlined_call_operand.vmem [shape: f32[1,128], index: 2, kind: input, shape index: {}]   ;;  %s1698_s3 = inlined_call_operand.vmem [shape: f32[1,128], index: 3, kind: input, shape index: {}]   ;;  %s1699_s4 = inlined_call_operand.vmem [shape: f32[1,128], index: 4, kind: input, shape index: {}]   ;;  %s1700_s5 = inlined_call_operand.hbm [shape: f32[128,384], index: 5, kind: input, shape index: {}]   ;;  %s1701_s6 = inlined_call_operand.vmem [shape: f32[1,384], index: 6, kind: input, shape index: {}]   ;;  %s1702_s7 = inlined_call_operand.hbm [shape: f32[32,384], index: 7, kind: output, shape index: {}]  }
   0x1   :  { %13 = vsyncpa [#allocation7], 0 }
   0x2   :  { %14 = vsyncpa [#allocation5], 0 }
   0x3   :  { %16 = vsyncpa [#allocation5 + $0x1], 0  ;;  %s1380_s24 = smov 0   ;;  %s1382_s25 = smov 0  }
   0x4   :  { %s1384_s26 = smov 0   ;;  %s1386_s27 = smov 0  }
   0x5   :  { %s1388_s28 = smov 0   ;;  %s1390_s29 = smov 0  }
   0x6 LB: > { %1712 = sst [smem:[#allocation14_spill]] %s1308_s24  ;;  %s1411_s30 = sadd.s32 4294967295, %s1328_s29   ;;  %s1328_s29 = sphi %s1390_s29, %s22_s29   ;;  %s1324_s28 = sphi %s1388_s28, %s1739_s28   ;;  %s1320_s27 = sphi %s1386_s27, %s1738_s27   ;;  %s1316_s26 = sphi %s1384_s26, %s1737_s26   ;;  %s1312_s25 = sphi %s1382_s25, %s1736_s25   ;;  %s1308_s24 = sphi %s1380_s24, %s1735_s24  }
   0x7   : > { %s814_s8 = sadd.s32 4294967294, %s1328_s29   ;;  %p158_p0 = scmp.ne.s32.totalorder %s1316_s26, %s1312_s25 }
   0x8   : > { %p159_p1 = scmp.eq.s32.totalorder %s1328_s29, 0  ;;  %p164_p2 = scmp.ne.s32.totalorder %s1312_s25, %s1308_s24 }
   0x9   : > { %p1703_p3 = scmp.eq.s32.totalorder %s1411_s30, 0  ;;  %p216_p4 = scmp.eq.s32.totalorder %s1411_s30, 2 }
   0xa   : > { %p1422_p5 = por %p159_p1, %p158_p0  ;;  %p222_p6 = scmp.eq.s32.totalorder %s814_s8, 2 }
   0xb   : > { %p1428_p7 = por %p1703_p3, %p164_p2  ;;  %p1432_p8 = por %p216_p4, %p158_p0 }
   0xc   : > { %p1436_p9 = por %p222_p6, %p164_p2  ;;  %p815_p10 = scmp.ge.s32.totalorder %s1328_s29, 1 }
   0xd   : > { %s1714_s11 = scalar_select %p1428_p7, 1, 0 }
   0xe   : > { %s1715_s12 = scalar_select %p1432_p8, 1, 0 }
   0xf   : > { %s1717_s13 = scalar_select %p1436_p9, 1, 0 }
  0x10   : > { %1716 = sst [smem:[#allocation15_spill]] %s1715_s12  ;;  %p229_p11 = scmp.lt.s32.totalorder %s1328_s29, 4 }
  0x11   : > { %1718 = sst [smem:[#allocation16_spill]] %s1717_s13  ;;  %s1330_s15 = smov [#allocation3]  }
  0x12   : > { %p1442_p12 = pnand %p815_p10, %p229_p11  ;;  %s244_s16 = sshll.u32 %s1330_s15, 4  ;;  %s1446_s16 = int_to_ptr.vmem [resolvable:$true] %s244_s16 }
  0x13   : > { %p1076_p0 = scmp.lt.s32.totalorder %s1328_s29, 3  ;;  %s1331_s18 = smov [#allocation6]  }
  0x14   : > { %p1059_p13 = pneg %p1442_p12  ;;  %s257_s19 = sshll.u32 %s1331_s18, 4  ;;  %s1463_s19 = int_to_ptr.vmem [resolvable:$true] %s257_s19 }
  0x15   : > { %p1459_p2 = pnand %p1076_p0, %p1422_p5  ;;  %s1152_s23 = scalar_lea.hbm %s1695_s0, 512 }
  0x16   : > { %p1453_p1 = pnand %p1059_p13, %p1703_p3  ;;  %p1153_p4 = scmp.ne.s32.totalorder %s1695_s0, %s1152_s23 }
  0x17   : > { %p1159_p5 = scmp.lt.u32.totalorder %s1152_s23, %s1695_s0 }
  0x18   : > { %p1154_p6 = pneg %p1453_p1 }
  0x1a   : > { %p1155_p10 = pnand %p1154_p6, %p1153_p4 }
  0x1c   : > { %p1156_p11 = pneg %p1155_p10 }
  0x1e   : > { %p1161_p13 = pnand %p1159_p5, %p1156_p11 }
  0x20   : > { %1164 = shalt.err (!%p1161_p13)
}
  0x21   : > { %s1165_s21 = scalar_lea.vmem %s1446_s16, 512  ;;  %p1173_p8 = scmp.lt.s32.totalorder %s1446_s16, %s1446_s16 }
  0x22   : > { %p1166_p0 = scmp.ne.s32.totalorder %s1446_s16, %s1165_s21  ;;  %p1174_p4 = scmp.lt.s32.totalorder %s1165_s21, %s1165_s21 }
  0x24   : > { %p1168_p3 = pnand %p1166_p0, %p1154_p6  ;;  %p1175_p10 = por %p1174_p4, %p1173_p8 }
  0x26   : > { %p1169_p9 = pneg %p1168_p3 }
  0x28   : > { %p1176_p7 = pnand %p1175_p10, %p1169_p9 }
  0x2a   : > { %1179 = shalt.err (!%p1176_p7)
}
  0x2b   : > { %s1710_s22 = smov 128   ;;  %s1711_s23 = smov 8  }
  0x2c   : > { %1062 = dma.hbm_to_vmem [thread:$0]  (!%p1453_p1), %s1695_s0, 512, %s1446_s16, [#allocation4], %s1710_s22, %s1710_s22, %s1711_s23  }
  0x2d   : > { %s1180_s21 = scalar_lea.hbm %s1696_s1, 2048 }
  0x2e   : > { %p1181_p3 = scmp.ne.s32.totalorder %s1696_s1, %s1180_s21  ;;  %p1187_p9 = scmp.lt.u32.totalorder %s1180_s21, %s1696_s1 }
  0x30   : > { %p1183_p7 = pnand %p1181_p3, %p1154_p6 }
  0x32   : > { %p1184_p8 = pneg %p1183_p7 }
  0x34   : > { %p1189_p11 = pnand %p1187_p9, %p1184_p8 }
  0x36   : > { %1192 = shalt.err (!%p1189_p11)
}
  0x37   : > { %s1193_s16 = scalar_lea.vmem %s1463_s19, 2048  ;;  %p1201_p4 = scmp.lt.s32.totalorder %s1463_s19, %s1463_s19 }
  0x38   : > { %p1194_p5 = scmp.ne.s32.totalorder %s1463_s19, %s1193_s16  ;;  %p1202_p10 = scmp.lt.s32.totalorder %s1193_s16, %s1193_s16 }
  0x3a   : > { %p1196_p13 = pnand %p1194_p5, %p1154_p6  ;;  %p1203_p3 = por %p1202_p10, %p1201_p4 }
  0x3c   : > { %p1197_p0 = pneg %p1196_p13 }
  0x3e   : > { %p1204_p7 = pnand %p1203_p3, %p1197_p0 }
  0x40   : > { %1207 = shalt.err (!%p1204_p7)
}
  0x41   : > { %1065 = dma.hbm_to_vmem [thread:$0]  (!%p1453_p1), %s1696_s1, 2048, %s1463_s19, [#allocation7], %s1710_s22, %s1710_s22, %s1711_s23  }
  0x42   : > { %s31_s12 = sadd.s32 1, %s1324_s28  ;;  %s280_s13 = sand.u32 1, %s1328_s29  }
  0x43   : > { %p32_p6 = scmp.ge.s32.totalorder %s31_s12, 3  ;;  %s282_s17 = sand.u32 1, %s1316_s26  }
  0x44   : > { %s820_s8 = sshll.u32 %s1324_s28, 7  ;;  %s819_s15 = sshll.u32 %s282_s17, 7 }
  0x45   : > { %s1741_s12 = smov (%p32_p6, %s31_s12), 0  ;;  %s1532_s21 = scalar_lea.hbm %s1700_s5, %s820_s8 }
  0x46   : > { %s148_s19 = ssub.s32 %s1324_s28, %s1741_s12  ;;  %s284_s16 = scalar_lea.vmem [#allocation8], %s819_s15 }
  0x47   : > { %p149_p1 = scmp.eq.s32.totalorder %s148_s19, 0  ;;  %s290_s24 = sshll.u32 %s284_s16, 4  ;;  %s1536_s24 = int_to_ptr.vmem [resolvable:$true] %s290_s24 }
  0x48   : > { %s1722_s9 = sadd.s32 1, %s1316_s26  ;;  %s1543_s23 = scalar_lea.sflag [#allocation4], %s280_s13 }
  0x49   : > { %s1541_s22 = scalar_select %p149_p1, %s1316_s26, %s1722_s9  }
  0x4a   : > { %s1208_s17 = scalar_lea.hbm %s1532_s21, 2048  ;;  %p1210_p9 = pneg %p1459_p2 }
  0x4b   : > { %p1209_p8 = scmp.ne.s32.totalorder %s1532_s21, %s1208_s17  ;;  %s1213_s15 = scalar_lea.hbm %s1700_s5, 6144 }
  0x4c   : > { %p1214_p13 = scmp.lt.u32.totalorder %s1532_s21, %s1700_s5  ;;  %p1215_p0 = scmp.lt.u32.totalorder %s1213_s15, %s1208_s17 }
  0x4d   : > { %p1211_p11 = pnand %p1210_p9, %p1209_p8  ;;  %p1217_p10 = scmp.lt.u32.totalorder %s1208_s17, %s1532_s21 }
  0x4e   : > { %p1216_p4 = por %p1215_p0, %p1214_p13 }
  0x4f   : > { %p1212_p5 = pneg %p1211_p11 }
  0x50   : > { %p1218_p3 = por %p1217_p10, %p1216_p4 }
  0x52   : > { %p1219_p7 = pnand %p1218_p3, %p1212_p5 }
  0x54   : > { %1222 = shalt.err (!%p1219_p7)
}
  0x55   : > { %s1223_s13 = scalar_lea.vmem %s1536_s24, 2048  ;;  %s1334_s16 = smov [#allocation8]  }
  0x56   : > { %p1224_p6 = scmp.ne.s32.totalorder %s1536_s24, %s1223_s13  ;;  %s1228_s9 = sshll.u32 %s1334_s16, 4  ;;  %s1229_s9 = int_to_ptr.vmem [resolvable:$false] %s1228_s9 }
  0x57   : > { %s1230_s8 = scalar_lea.vmem %s1229_s9, 4096  ;;  %p1231_p11 = scmp.lt.s32.totalorder %s1536_s24, %s1229_s9 }
  0x58   : > { %p1226_p1 = pnand %p1224_p6, %p1210_p9  ;;  %p1232_p13 = scmp.lt.s32.totalorder %s1230_s8, %s1223_s13 }
  0x5a   : > { %p1227_p8 = pneg %p1226_p1  ;;  %p1233_p0 = por %p1232_p13, %p1231_p11 }
  0x5c   : > { %p1234_p4 = pnand %p1233_p0, %p1227_p8 }
  0x5e   : > { %1237 = shalt.err (!%p1234_p4)
}
  0x5f   : > { %s1335_s17 = smov 384   ;;  %s1723_s10 = smov 8  }
  0x60   : > { %s1724_s15 = smov 128   ;;  %308 = sbr.rel (%p1442_p12) target bundleno = 970 (0x3ca), region = 48 }
  0x61   : > { %1069 = dma.hbm_to_vmem [thread:$0]  (!%p1459_p2), %s1532_s21, 2048, %s1536_s24, %s1543_s23, %s1335_s17, %s1724_s15, %s1723_s10  }
  0x62   : > { %p1725_p9 = scmp.eq.s32.totalorder (!%p1442_p12), %s1411_s30, 0 }
  0x67   : > { %1291 = dma.done.wait (%p1725_p9), [#allocation4], 512   ;;  %p1726_p5 = pmov %p1725_p9 }
  0x69   : > { %1293 = vsyncadd (%p1726_p5), [#allocation4], 4294966784  ;;  %p1727_p10 = pmov %p1726_p5 }
  0x6a   : > { %p1728_p3 = pmov %p1726_p5 }
  0x6b   : > { %1295 = dma.done.wait (%p1727_p10), [#allocation7], 2048  }
  0x6c   : > { %1297 = vsyncadd (%p1728_p3), [#allocation7], 4294965248  ;;  %s318_s20 = sand.u32 1, %s1411_s30   ;;  %s1585_s23 = sand.u32 1, %s1312_s25  }
  0x6d   : > { %s824_s14 = sshll.u32 %s1585_s23, 7  ;;  %s319_s21 = scalar_lea.sflag [#allocation4], %s318_s20 }
  0x6e   : > { %s1588_s24 = scalar_lea.vmem [#allocation8], %s824_s14  ;;  %p1729_p12 = scmp.ne.s32.totalorder %s1714_s11, 0 }
  0x70   : > { %1299 = dma.done.wait (%p1729_p12), %s319_s21, 2048  }
  0x71   : > { %1301 = vsyncadd (%p1729_p12), %s319_s21, 4294965248  ;;  %s825_s18 = sshll.u32 %s1585_s23, 5  ;;  %p357_p2 = scmp.lt.s32.totalorder %s1320_s27, 2 }
  0x72   : > { %s1603_s9 = scalar_lea.vmem [#allocation9], %s825_s18  ;;  %p826_p7 = scmp.ne.s32.totalorder %s1320_s27, 0 }
  0x73   : > { %s1597_s19 = scalar_select %p357_p2, %s1320_s27, 2 }
  0x74   : > { %364 = sbr.rel (%p826_p7) target bundleno = 704 (0x2c0), region = 64  ;;  %v369_v0 = vld [vmem:[#allocation6] sm:$0xff] (!%p826_p7)  ;;  %v370_v1 = vld [vmem:[#allocation6 + $0x8] sm:$0xff] (!%p826_p7)  ;;  %v371_v2 = vld [vmem:[#allocation6 + $0x10] sm:$0xff] (!%p826_p7) }
  0x75   : > { %s359_s16 = scalar_lea.vmem %s1701_s6, %s1597_s19  ;;  %v951_v3 = vpack.c.bf16 (!%p826_p7), %v370_v1, %v369_v0  ;;  %v372_v4 = vld [vmem:[#allocation6 + $0x18] sm:$0xff] (!%p826_p7)  ;;  %v373_v6 = vld [vmem:[#allocation6 + $0x20] sm:$0xff] (!%p826_p7)  ;;  %v374_v7 = vld [vmem:[#allocation6 + $0x28] sm:$0xff] (!%p826_p7) }
  0x76   : > { %v955_v5 = vpack.c.bf16 (!%p826_p7), %v372_v4, %v371_v2  ;;  %v959_v8 = vpack.c.bf16 (!%p826_p7), %v374_v7, %v373_v6  ;;  %v365_v9 = vld [vmem:[#allocation3] sm:$0xff] (!%p826_p7)  ;;  %v367_v10 = vld [vmem:[#allocation3 + $0x10] sm:$0xff] (!%p826_p7)  ;;  %v376_v12 = vld [vmem:[#allocation6 + $0x38] sm:$0xff] (!%p826_p7) }
  0x77   : > { %952 = vmatprep.subr.bf16.mxu0 (!%p826_p7), %v951_v3  ;;  %1015 = vmatprep.subr.bf16.mxu1 (!%p826_p7), %v951_v3  ;;  %v375_v11 = vld [vmem:[#allocation6 + $0x30] sm:$0xff] (!%p826_p7)  ;;  %v377_v14 = vld [vmem:[#allocation6 + $0x40] sm:$0xff] (!%p826_p7)  ;;  %v378_v15 = vld [vmem:[#allocation6 + $0x48] sm:$0xff] (!%p826_p7) }
  0x78   : > { %954 = vmatpush3.bf16.msra.mxu0 (!%p826_p7), %v951_v3  ;;  %1023 = vmatpush3.bf16.msra.mxu1 (!%p826_p7), %v951_v3  ;;  %v963_v13 = vpack.c.bf16 (!%p826_p7), %v376_v12, %v375_v11  ;;  %v967_v16 = vpack.c.bf16 (!%p826_p7), %v378_v15, %v377_v14  ;;  %v379_v17 = vld [vmem:[#allocation6 + $0x50] sm:$0xff] (!%p826_p7)  ;;  %v380_v18 = vld [vmem:[#allocation6 + $0x58] sm:$0xff] (!%p826_p7)  ;;  %v381_v20 = vld [vmem:[#allocation6 + $0x60] sm:$0xff] (!%p826_p7) }
  0x79   : > { %956 = vmatprep.subr.bf16.mxu0 (!%p826_p7), %v955_v5  ;;  %1016 = vmatprep.subr.bf16.mxu1 (!%p826_p7), %v955_v5  ;;  %v971_v19 = vpack.c.bf16 (!%p826_p7), %v380_v18, %v379_v17  ;;  %v382_v21 = vld [vmem:[#allocation6 + $0x68] sm:$0xff] (!%p826_p7)  ;;  %v383_v23 = vld [vmem:[#allocation6 + $0x70] sm:$0xff] (!%p826_p7)  ;;  %v384_v24 = vld [vmem:[#allocation6 + $0x78] sm:$0xff] (!%p826_p7) }
  0x7a   : > { %907 = vmatprep.mubr.f32.mxu0 (!%p826_p7), %v365_v9  ;;  %910 = vmatprep.mubr.f32.mxu1 (!%p826_p7), %v367_v10  ;;  %v975_v22 = vpack.c.bf16 (!%p826_p7), %v382_v21, %v381_v20  ;;  %v979_v25 = vpack.c.bf16 (!%p826_p7), %v384_v24, %v383_v23  ;;  %v366_v26 = vld [vmem:[#allocation3 + $0x8] sm:$0xff] (!%p826_p7)  ;;  %v368_v27 = vld [vmem:[#allocation3 + $0x18] sm:$0xff] (!%p826_p7)  ;;  %v827_v28 = vld [vmem:[%s1697_s2] ss:$0 sm:$0xff] (!%p826_p7) }
  0x7b   : > { %v829_v24 = vld [vmem:[%s1699_s4] ss:$0 sm:$0xff] }
  0x7c   : > { %958 = vmatpush3.bf16.msra.mxu0 %v955_v5  ;;  %1024 = vmatpush3.bf16.msra.mxu1 %v955_v5 }
  0x7d   : > { %960 = vmatprep.subr.bf16.mxu0 %v959_v8  ;;  %1017 = vmatprep.subr.bf16.mxu1 %v959_v8 }
  0x80   : > { %962 = vmatpush3.bf16.msra.mxu0 %v959_v8  ;;  %1025 = vmatpush3.bf16.msra.mxu1 %v959_v8 }
  0x81   : > { %964 = vmatprep.subr.bf16.mxu0 %v963_v13  ;;  %1018 = vmatprep.subr.bf16.mxu1 %v963_v13 }
  0x84   : > { %966 = vmatpush3.bf16.msra.mxu0 %v963_v13  ;;  %1026 = vmatpush3.bf16.msra.mxu1 %v963_v13 }
  0x85   : > { %968 = vmatprep.subr.bf16.mxu0 %v967_v16  ;;  %1019 = vmatprep.subr.bf16.mxu1 %v967_v16 }
  0x88   : > { %970 = vmatpush3.bf16.msra.mxu0 %v967_v16  ;;  %1027 = vmatpush3.bf16.msra.mxu1 %v967_v16 }
  0x89   : > { %972 = vmatprep.subr.bf16.mxu0 %v971_v19  ;;  %1020 = vmatprep.subr.bf16.mxu1 %v971_v19 }
  0x8c   : > { %974 = vmatpush3.bf16.msra.mxu0 %v971_v19  ;;  %1028 = vmatpush3.bf16.msra.mxu1 %v971_v19 }
  0x8d   : > { %976 = vmatprep.subr.bf16.mxu0 %v975_v22  ;;  %1021 = vmatprep.subr.bf16.mxu1 %v975_v22 }
  0x90   : > { %978 = vmatpush3.bf16.msra.mxu0 %v975_v22  ;;  %1029 = vmatpush3.bf16.msra.mxu1 %v975_v22  ;;  %v828_v22 = vld [vmem:[%s1698_s3] ss:$0 sm:$0xff] }
  0x91   : > { %980 = vmatprep.subr.bf16.mxu0 %v979_v25  ;;  %1022 = vmatprep.subr.bf16.mxu1 %v979_v25 }
  0x94   : > { %982 = vmatpush3.bf16.msra.mxu0 %v979_v25  ;;  %1030 = vmatpush3.bf16.msra.mxu1 %v979_v25 }
  0x97   : > { %908 = vmatmul.mubr.f32.vlgmr.msra.gmra.mrb[0].mxu0 %v366_v26  ;;  %911 = vmatmul.mubr.f32.vlgmr.msra.gmra.mrb[0].mxu1 %v368_v27 }
 0x16a   : > { %v909_v29 = vpop.f32.mrb[0].mxu0  ;;  %v912_v30 = vpop.f32.mrb[0].mxu1 }
 0x16b   : > { %v464_v31 = vadd.f32 %v909_v29, %v827_v28  ;;  %v474_v32 = vadd.f32 %v912_v30, %v827_v28  ;;  %v458_v33 = vpop.f32.mrb[1].mxu0  ;;  %v468_v34 = vpop.f32.mrb[1].mxu1 }
 0x16c   : > { %v459_v35 = vadd.f32 %v827_v28, %v458_v33  ;;  %v469_v36 = vadd.f32 %v827_v28, %v468_v34 }
 0x16d   : > { %v482_v37 = vmul.f32 0.70710677, %v464_v31  ;;  %v484_v38 = vmul.f32 0.70710677, %v474_v32  ;;  %v478_v53 = vmul.f32 0.5, %v464_v31  ;;  %v480_v54 = vmul.f32 0.5, %v474_v32 }
 0x16e   : > { %v481_v39 = vmul.f32 0.70710677, %v459_v35  ;;  %v483_v40 = vmul.f32 0.70710677, %v469_v36  ;;  %v477_v45 = vmul.f32 0.5, %v459_v35  ;;  %v479_v47 = vmul.f32 0.5, %v469_v36 }
 0x16f   : > { %1136 = verf.f32 %v482_v37 }
 0x170   : > { %1138 = verf.f32 %v484_v38 }
 0x171   : > { %1140 = verf.f32 %v481_v39 }
 0x172   : > { %1142 = verf.f32 %v483_v40 }
 0x179   : > { %v1137_v41 = vpop.eup %1136 }
 0x17a   : > { %v1139_v42 = vpop.eup %1138  ;;  %v490_v50 = vadd.f32 1.0, %v1137_v41 }
 0x17b   : > { %v1141_v43 = vpop.eup %1140  ;;  %v492_v52 = vadd.f32 1.0, %v1139_v42 }
 0x17c   : > { %v1143_v44 = vpop.eup %1142  ;;  %v489_v46 = vadd.f32 1.0, %v1141_v43  ;;  %v494_v55 = vmul.f32 %v490_v50, %v478_v53 }
 0x17d   : > { %v491_v48 = vadd.f32 1.0, %v1143_v44  ;;  %v496_v56 = vmul.f32 %v492_v52, %v480_v54 }
 0x17e   : > { %v493_v49 = vmul.f32 %v489_v46, %v477_v45 }
 0x17f   : > { %v495_v51 = vmul.f32 %v491_v48, %v479_v47 }
 0x180   : > { %497 = vadd.xlane.f32.xlu0 %v493_v49 }
 0x181   : > { %501 = vadd.xlane.f32.xlu1 %v495_v51 }
 0x184   : > { %499 = vadd.xlane.f32.xlu0 %v494_v55 }
 0x185   : > { %503 = vadd.xlane.f32.xlu1 %v496_v56 }
 0x20d   : > { %v498_v57 = vpop.xlane.xlu0 %497 }
 0x20e   : > { %v502_v58 = vpop.xlane.xlu1 %501  ;;  %v506_v59 = vmul.f32 0.0078125, %v498_v57 }
 0x20f   : > { %v508_v60 = vmul.f32 0.0078125, %v502_v58 }
 0x210   : > { %v510_v61 = vsub.f32 %v493_v49, %v506_v59 }
 0x211   : > { %v500_v62 = vpop.xlane.xlu0 %499  ;;  %v512_v63 = vsub.f32 %v495_v51, %v508_v60 }
 0x212   : > { %v504_v0 = vpop.xlane.xlu1 %503  ;;  %v507_v1 = vmul.f32 0.0078125, %v500_v62  ;;  %v514_v2 = vmul.f32 %v510_v61, %v510_v61 }
 0x213   : > { %v509_v3 = vmul.f32 0.0078125, %v504_v0  ;;  %v516_v6 = vmul.f32 %v512_v63, %v512_v63 }
 0x214   : > { %v511_v4 = vsub.f32 %v494_v55, %v507_v1  ;;  %518 = vadd.xlane.f32.xlu0 %v514_v2 }
 0x215   : > { %v513_v5 = vsub.f32 %v496_v56, %v509_v3 }
 0x216   : > { %v515_v7 = vmul.f32 %v511_v4, %v511_v4 }
 0x217   : > { %v517_v8 = vmul.f32 %v513_v5, %v513_v5 }
 0x218   : > { %522 = vadd.xlane.f32.xlu0 %v516_v6  ;;  %520 = vadd.xlane.f32.xlu1 %v515_v7 }
 0x21c   : > { %524 = vadd.xlane.f32.xlu1 %v517_v8 }
 0x2a1   : > { %v519_v9 = vpop.xlane.xlu0 %518 }
 0x2a2   : > { %v526_v10 = vmul.f32 0.0078125, %v519_v9 }
 0x2a4   : > { %v530_v11 = vadd.f32 1e-05, %v526_v10 }
 0x2a5   : > { %v521_v12 = vpop.xlane.xlu1 %520  ;;  %v523_v13 = vpop.xlane.xlu0 %522 }
 0x2a6   : > { %1144 = vrsqrt.f32 %v530_v11  ;;  %v527_v14 = vmul.f32 0.0078125, %v521_v12  ;;  %v528_v15 = vmul.f32 0.0078125, %v523_v13 }
 0x2a8   : > { %v531_v16 = vadd.f32 1e-05, %v527_v14  ;;  %v532_v17 = vadd.f32 1e-05, %v528_v15 }
 0x2a9   : > { %v525_v18 = vpop.xlane.xlu1 %524 }
 0x2aa   : > { %1146 = vrsqrt.f32 %v531_v16  ;;  %v529_v19 = vmul.f32 0.0078125, %v525_v18 }
 0x2ab   : > { %1148 = vrsqrt.f32 %v532_v17 }
 0x2ac   : > { %v533_v20 = vadd.f32 1e-05, %v529_v19 }
 0x2ae   : > { %1150 = vrsqrt.f32 %v533_v20 }
 0x2b0   : > { %v1145_v21 = vpop.eup %1144 }
 0x2b1   : > { %v538_v23 = vmul.f32 %v1145_v21, %v510_v61 }
 0x2b3   : > { %v549_v25 = vmul.f32 %v828_v22, %v538_v23 }
 0x2b4   : > { %v1147_v26 = vpop.eup %1146 }
 0x2b5   : > { %v1149_v27 = vpop.eup %1148  ;;  %v560_v28 = vadd.f32 %v829_v24, %v549_v25  ;;  %v539_v29 = vmul.f32 %v1147_v26, %v511_v4 }
 0x2b6   : > { %v540_v30 = vmul.f32 %v1149_v27, %v512_v63 }
 0x2b7   : > { %564 = vst [vmem:[#allocation2] sm:$0xff] %v560_v28  ;;  %v550_v31 = vmul.f32 %v828_v22, %v539_v29 }
 0x2b8   : > { %v1151_v32 = vpop.eup %1150  ;;  %v551_v33 = vmul.f32 %v828_v22, %v540_v30 }
 0x2b9   : > { %v561_v34 = vadd.f32 %v829_v24, %v550_v31  ;;  %v541_v35 = vmul.f32 %v1151_v32, %v513_v5 }
 0x2ba   : > { %v562_v36 = vadd.f32 %v829_v24, %v551_v33 }
 0x2bb   : > { %565 = vst [vmem:[#allocation2 + $0x8] sm:$0xff] %v561_v34  ;;  %v552_v37 = vmul.f32 %v828_v22, %v541_v35 }
 0x2bc   : > { %566 = vst [vmem:[#allocation2 + $0x10] sm:$0xff] %v562_v36 }
 0x2bd   : > { %v563_v38 = vadd.f32 %v829_v24, %v552_v37 }
 0x2bf   : > { %567 = vst [vmem:[#allocation2 + $0x18] sm:$0xff] %v563_v38 }
 0x2c0 PF: > { %v572_v39 = vld [vmem:[%s1588_s24] sm:$0xff]  ;;  %v573_v40 = vld [vmem:[%s1588_s24 + $0x8] sm:$0xff]  ;;  %v574_v41 = vld [vmem:[%s1588_s24 + $0x10] sm:$0xff]  ;;  %s832_s14 = sshll.u32 %s1320_s27, 7  ;;  %s700_s18 = sshll.u32 %s1603_s9, 4  ;;  %s1643_s18 = int_to_ptr.vmem [resolvable:$true] %s700_s18 }
 0x2c1   : > { %v983_v42 = vpack.c.bf16 %v573_v40, %v572_v39  ;;  %v575_v43 = vld [vmem:[%s1588_s24 + $0x18] sm:$0xff]  ;;  %v576_v45 = vld [vmem:[%s1588_s24 + $0x20] sm:$0xff]  ;;  %v577_v46 = vld [vmem:[%s1588_s24 + $0x28] sm:$0xff]  ;;  %s1730_s11 = sld [smem:[#allocation15_spill]]  ;;  %s1641_s8 = scalar_lea.hbm %s1702_s7, %s832_s14 }
 0x2c2   : > { %v987_v44 = vpack.c.bf16 %v575_v43, %v574_v41  ;;  %v991_v47 = vpack.c.bf16 %v577_v46, %v576_v45  ;;  %v568_v48 = vld [vmem:[#allocation2] sm:$0xff]  ;;  %v578_v50 = vld [vmem:[%s1588_s24 + $0x30] sm:$0xff]  ;;  %v579_v51 = vld [vmem:[%s1588_s24 + $0x38] sm:$0xff]  ;;  %s685_s27 = scalar_lea.sflag [#allocation5], %s1585_s23  ;;  %s1238_s19 = scalar_lea.vmem %s1643_s18, 512 }
 0x2c3   : > { %984 = vmatprep.subr.bf16.mxu0 %v983_v42  ;;  %1031 = vmatprep.subr.bf16.mxu1 %v983_v42  ;;  %v570_v49 = vld [vmem:[#allocation2 + $0x10] sm:$0xff]  ;;  %v995_v52 = vpack.c.bf16 %v579_v51, %v578_v50  ;;  %v580_v53 = vld [vmem:[%s1588_s24 + $0x40] sm:$0xff]  ;;  %v581_v54 = vld [vmem:[%s1588_s24 + $0x48] sm:$0xff]  ;;  %p1239_p6 = scmp.ne.s32.totalorder %s1643_s18, %s1238_s19 }
 0x2c4   : > { %986 = vmatpush3.bf16.msra.mxu0 %v983_v42  ;;  %1039 = vmatpush3.bf16.msra.mxu1 %v983_v42  ;;  %v999_v55 = vpack.c.bf16 %v581_v54, %v580_v53  ;;  %v582_v56 = vld [vmem:[%s1588_s24 + $0x50] sm:$0xff]  ;;  %v583_v57 = vld [vmem:[%s1588_s24 + $0x58] sm:$0xff]  ;;  %v584_v59 = vld [vmem:[%s1588_s24 + $0x60] sm:$0xff] }
 0x2c5   : > { %988 = vmatprep.subr.bf16.mxu0 %v987_v44  ;;  %1032 = vmatprep.subr.bf16.mxu1 %v987_v44  ;;  %v1003_v58 = vpack.c.bf16 %v583_v57, %v582_v56  ;;  %v585_v60 = vld [vmem:[%s1588_s24 + $0x68] sm:$0xff]  ;;  %v586_v62 = vld [vmem:[%s1588_s24 + $0x70] sm:$0xff]  ;;  %v587_v63 = vld [vmem:[%s1588_s24 + $0x78] sm:$0xff] }
 0x2c6   : > { %945 = vmatprep.mubr.f32.mxu0 %v568_v48  ;;  %948 = vmatprep.mubr.f32.mxu1 %v570_v49  ;;  %v1007_v61 = vpack.c.bf16 %v585_v60, %v584_v59  ;;  %v1011_v0 = vpack.c.bf16 %v587_v63, %v586_v62  ;;  %v569_v1 = vld [vmem:[#allocation2 + $0x8] sm:$0xff]  ;;  %v571_v2 = vld [vmem:[#allocation2 + $0x18] sm:$0xff]  ;;  %v830_v3 = vld [vmem:[%s359_s16] ss:$0 sm:$0xff]  ;;  %s1336_s16 = smov [#allocation9]  }
 0x2c7   : > { %p1731_p1 = scmp.ne.s32.totalorder %s1730_s11, 0  ;;  %s1242_s17 = sshll.u32 %s1336_s16, 4  ;;  %s1243_s17 = int_to_ptr.vmem [resolvable:$false] %s1242_s17 }
 0x2c8   : > { %990 = vmatpush3.bf16.msra.mxu0 %v987_v44  ;;  %1040 = vmatpush3.bf16.msra.mxu1 %v987_v44  ;;  %s1244_s10 = scalar_lea.vmem %s1243_s17, 1024  ;;  %p1245_p13 = scmp.lt.s32.totalorder %s1643_s18, %s1243_s17 }
 0x2c9   : > { %992 = vmatprep.subr.bf16.mxu0 %v991_v47  ;;  %1033 = vmatprep.subr.bf16.mxu1 %v991_v47  ;;  %p1240_p8 = pnand %p1239_p6, %p1731_p1  ;;  %p1246_p0 = scmp.lt.s32.totalorder %s1244_s10, %s1238_s19 }
 0x2cb   : > { %p1241_p11 = pneg %p1240_p8  ;;  %p1247_p4 = por %p1246_p0, %p1245_p13 }
 0x2cc   : > { %994 = vmatpush3.bf16.msra.mxu0 %v991_v47  ;;  %1041 = vmatpush3.bf16.msra.mxu1 %v991_v47 }
 0x2cd   : > { %996 = vmatprep.subr.bf16.mxu0 %v995_v52  ;;  %1034 = vmatprep.subr.bf16.mxu1 %v995_v52  ;;  %p1248_p9 = pnand %p1247_p4, %p1241_p11 }
 0x2d0   : > { %998 = vmatpush3.bf16.msra.mxu0 %v995_v52  ;;  %1042 = vmatpush3.bf16.msra.mxu1 %v995_v52 }
 0x2d1   : > { %1000 = vmatprep.subr.bf16.mxu0 %v999_v55  ;;  %1035 = vmatprep.subr.bf16.mxu1 %v999_v55 }
 0x2d4   : > { %1002 = vmatpush3.bf16.msra.mxu0 %v999_v55  ;;  %1043 = vmatpush3.bf16.msra.mxu1 %v999_v55 }
 0x2d5   : > { %1004 = vmatprep.subr.bf16.mxu0 %v1003_v58  ;;  %1036 = vmatprep.subr.bf16.mxu1 %v1003_v58 }
 0x2d8   : > { %1006 = vmatpush3.bf16.msra.mxu0 %v1003_v58  ;;  %1044 = vmatpush3.bf16.msra.mxu1 %v1003_v58 }
 0x2d9   : > { %1008 = vmatprep.subr.bf16.mxu0 %v1007_v61  ;;  %1037 = vmatprep.subr.bf16.mxu1 %v1007_v61 }
 0x2dc   : > { %1010 = vmatpush3.bf16.msra.mxu0 %v1007_v61  ;;  %1045 = vmatpush3.bf16.msra.mxu1 %v1007_v61 }
 0x2dd   : > { %1012 = vmatprep.subr.bf16.mxu0 %v1011_v0  ;;  %1038 = vmatprep.subr.bf16.mxu1 %v1011_v0 }
 0x2e0   : > { %1014 = vmatpush3.bf16.msra.mxu0 %v1011_v0  ;;  %1046 = vmatpush3.bf16.msra.mxu1 %v1011_v0 }
 0x2e3   : > { %946 = vmatmul.mubr.f32.vlgmr.msra.gmra.mrb[0].mxu0 %v569_v1  ;;  %949 = vmatmul.mubr.f32.vlgmr.msra.gmra.mrb[0].mxu1 %v571_v2 }
 0x3b6   : > { %v947_v4 = vpop.f32.mrb[0].mxu0  ;;  %v950_v5 = vpop.f32.mrb[0].mxu1 }
 0x3b7   : > { %v667_v6 = vadd.f32 %v947_v4, %v830_v3  ;;  %v677_v7 = vadd.f32 %v950_v5, %v830_v3  ;;  %v661_v8 = vpop.f32.mrb[1].mxu0  ;;  %v671_v9 = vpop.f32.mrb[1].mxu1 }
 0x3b8   : > { %v662_v10 = vadd.f32 %v830_v3, %v661_v8  ;;  %v672_v11 = vadd.f32 %v830_v3, %v671_v9 }
 0x3b9   : > { %681 = vst [vmem:[%s1603_s9 + $0x8] sm:$0xff] %v667_v6  ;;  %683 = vst [vmem:[%s1603_s9 + $0x18] sm:$0xff] %v677_v7 }
 0x3ba   : > { %680 = vst [vmem:[%s1603_s9] sm:$0xff] %v662_v10  ;;  %682 = vst [vmem:[%s1603_s9 + $0x10] sm:$0xff] %v672_v11 }
 0x3bb   : > { %1251 = shalt.err (!%p1248_p9)
}
 0x3bc   : > { %s1252_s9 = scalar_lea.hbm %s1641_s8, 512  ;;  %s1256_s14 = scalar_lea.hbm %s1702_s7, 1536 }
 0x3bd   : > { %p1253_p5 = scmp.ne.s32.totalorder %s1641_s8, %s1252_s9  ;;  %p1257_p12 = scmp.lt.u32.totalorder %s1641_s8, %s1702_s7 }
 0x3be   : > { %p1258_p2 = scmp.lt.u32.totalorder %s1256_s14, %s1252_s9  ;;  %p1260_p6 = scmp.lt.u32.totalorder %s1252_s9, %s1641_s8 }
 0x3bf   : > { %p1254_p10 = pnand %p1253_p5, %p1731_p1 }
 0x3c0   : > { %p1259_p7 = por %p1258_p2, %p1257_p12 }
 0x3c1   : > { %p1255_p3 = pneg %p1254_p10 }
 0x3c2   : > { %p1261_p8 = por %p1260_p6, %p1259_p7 }
 0x3c4   : > { %p1262_p11 = pnand %p1261_p8, %p1255_p3 }
 0x3c6   : > { %1265 = shalt.err (!%p1262_p11)
}
 0x3c7   : > { %s1337_s30 = smov 128   ;;  %s1338_s13 = smov 384  }
 0x3c8   : > { %s1339_s19 = smov 8  }
 0x3c9   : > { %1057 = dma.vmem_to_hbm [thread:$0]  (%p1731_p1), %s1643_s18, 512, %s1641_s8, %s685_s27, %s1337_s30, %s1338_s13, %s1339_s19  }
 0x3ca PF: > { %s1732_s16 = sld [smem:[#allocation14_spill]]  ;;  %s1733_s17 = sld [smem:[#allocation16_spill]] }
 0x3cb   : > { %p1079_p13 = scmp.ge.s32.totalorder %s1328_s29, 2 }
 0x3d0   : > { %s715_s10 = sand.u32 1, %s1732_s16   ;;  %p1734_p0 = scmp.ne.s32.totalorder %s1733_s17, 0 }
 0x3d1   : > { %s716_s9 = scalar_lea.sflag [#allocation5], %s715_s10 }
 0x3d2   : > { %p1071_p4 = pnand %p1079_p13, %p1734_p0 }
 0x3d4   : > { %1303 = dma.done.wait (!%p1071_p4), %s716_s9, 512  }
 0x3d5   : > { %1305 = vsyncadd (!%p1071_p4), %s716_s9, 4294966784  ;;  %s22_s29 = sadd.s32 1, %s1328_s29   ;;  %s1735_s24 = smov %s1312_s25 }
 0x3d6   : > { %p19_p9 = scmp.ge.s32.totalorder %s22_s29, 5   ;;  %s1736_s25 = smov %s1316_s26 }
 0x3d7   : > { %s1737_s26 = smov %s1541_s22  ;;  %s1738_s27 = smov %s1324_s28 }
 0x3d8   : > { %s1739_s28 = smov %s1741_s12  ;;  %21 = sbr.rel (!%p19_p9) target bundleno = 6 (0x6), region = 108 }
 0x3df   :  { %721 = vsyncpa [#allocation4], 1 }
 0x3e0   :  { %723 = vsyncpa [#allocation4 + $0x1], 1 }
 0x3e1   :  { %724 = vsyncpa [#allocation7], 1 }
 0x3e2   :  { %725 = vsyncpa [#allocation5], 1 }
 0x3e3   :  { %727 = vsyncpa [#allocation5 + $0x1], 1 }

// kernel: tpu_custom_call.1
= control target key start
LH: loop header
LB: loop body
LE: loop exit
PB: predicated region body
PF: predicated region fallthrough
CT: control target
= control target key end

     0   :  { %12 = vsyncpa [#allocation4], 0  ;;  %s1695_s0 = inlined_call_operand.hbm [shape: f32[32,128], index: 0, kind: input, shape index: {}]   ;;  %s1696_s1 = inlined_call_operand.hbm [shape: f32[128,128], index: 1, kind: input, shape index: {}]   ;;  %s1697_s2 = inlined_call_operand.vmem [shape: f32[1,128], index: 2, kind: input, shape index: {}]   ;;  %s1698_s3 = inlined_call_operand.vmem [shape: f32[1,128], index: 3, kind: input, shape index: {}]   ;;  %s1699_s4 = inlined_call_operand.vmem [shape: f32[1,128], index: 4, kind: input, shape index: {}]   ;;  %s1700_s5 = inlined_call_operand.hbm [shape: f32[128,384], index: 5, kind: input, shape index: {}]   ;;  %s1701_s6 = inlined_call_operand.vmem [shape: f32[1,384], index: 6, kind: input, shape index: {}]   ;;  %s1702_s7 = inlined_call_operand.hbm [shape: f32[32,384], index: 7, kind: output, shape index: {}]  }
   0x1   :  { %13 = vsyncpa [#allocation7], 0 }
   0x2   :  { %14 = vsyncpa [#allocation5], 0 }
   0x3   :  { %16 = vsyncpa [#allocation5 + $0x1], 0  ;;  %s1380_s24 = smov 0   ;;  %s1382_s25 = smov 0  }
   0x4   :  { %s1384_s26 = smov 0   ;;  %s1386_s27 = smov 0  }
   0x5   :  { %s1388_s28 = smov 0   ;;  %s1390_s29 = smov 0  }
   0x6 LB: > { %1712 = sst [smem:[#allocation14_spill]] %s1308_s24  ;;  %s1411_s30 = sadd.s32 4294967295, %s1328_s29   ;;  %s1328_s29 = sphi %s1390_s29, %s22_s29   ;;  %s1324_s28 = sphi %s1388_s28, %s1739_s28   ;;  %s1320_s27 = sphi %s1386_s27, %s1738_s27   ;;  %s1316_s26 = sphi %s1384_s26, %s1737_s26   ;;  %s1312_s25 = sphi %s1382_s25, %s1736_s25   ;;  %s1308_s24 = sphi %s1380_s24, %s1735_s24  }
   0x7   : > { %s814_s8 = sadd.s32 4294967294, %s1328_s29   ;;  %p158_p0 = scmp.ne.s32.totalorder %s1316_s26, %s1312_s25 }
   0x8   : > { %p159_p1 = scmp.eq.s32.totalorder %s1328_s29, 0  ;;  %p164_p2 = scmp.ne.s32.totalorder %s1312_s25, %s1308_s24 }
   0x9   : > { %p1703_p3 = scmp.eq.s32.totalorder %s1411_s30, 0  ;;  %p216_p4 = scmp.eq.s32.totalorder %s1411_s30, 2 }
   0xa   : > { %p1422_p5 = por %p159_p1, %p158_p0  ;;  %p222_p6 = scmp.eq.s32.totalorder %s814_s8, 2 }
   0xb   : > { %p1428_p7 = por %p1703_p3, %p164_p2  ;;  %p1432_p8 = por %p216_p4, %p158_p0 }
   0xc   : > { %p1436_p9 = por %p222_p6, %p164_p2  ;;  %p815_p10 = scmp.ge.s32.totalorder %s1328_s29, 1 }
   0xd   : > { %s1714_s11 = scalar_select %p1428_p7, 1, 0 }
   0xe   : > { %s1715_s12 = scalar_select %p1432_p8, 1, 0 }
   0xf   : > { %s1717_s13 = scalar_select %p1436_p9, 1, 0 }
  0x10   : > { %1716 = sst [smem:[#allocation15_spill]] %s1715_s12  ;;  %p229_p11 = scmp.lt.s32.totalorder %s1328_s29, 4 }
  0x11   : > { %1718 = sst [smem:[#allocation16_spill]] %s1717_s13  ;;  %s1330_s15 = smov [#allocation3]  }
  0x12   : > { %p1442_p12 = pnand %p815_p10, %p229_p11  ;;  %s244_s16 = sshll.u32 %s1330_s15, 4  ;;  %s1446_s16 = int_to_ptr.vmem [resolvable:$true] %s244_s16 }
  0x13   : > { %p1076_p0 = scmp.lt.s32.totalorder %s1328_s29, 3  ;;  %s1331_s18 = smov [#allocation6]  }
  0x14   : > { %p1059_p13 = pneg %p1442_p12  ;;  %s257_s19 = sshll.u32 %s1331_s18, 4  ;;  %s1463_s19 = int_to_ptr.vmem [resolvable:$true] %s257_s19 }
  0x15   : > { %p1459_p2 = pnand %p1076_p0, %p1422_p5  ;;  %s1152_s23 = scalar_lea.hbm %s1695_s0, 512 }
  0x16   : > { %p1453_p1 = pnand %p1059_p13, %p1703_p3  ;;  %p1153_p4 = scmp.ne.s32.totalorder %s1695_s0, %s1152_s23 }
  0x17   : > { %p1159_p5 = scmp.lt.u32.totalorder %s1152_s23, %s1695_s0 }
  0x18   : > { %p1154_p6 = pneg %p1453_p1 }
  0x1a   : > { %p1155_p10 = pnand %p1154_p6, %p1153_p4 }
  0x1c   : > { %p1156_p11 = pneg %p1155_p10 }
  0x1e   : > { %p1161_p13 = pnand %p1159_p5, %p1156_p11 }
  0x20   : > { %1164 = shalt.err (!%p1161_p13)
}
  0x21   : > { %s1165_s21 = scalar_lea.vmem %s1446_s16, 512  ;;  %p1173_p8 = scmp.lt.s32.totalorder %s1446_s16, %s1446_s16 }
  0x22   : > { %p1166_p0 = scmp.ne.s32.totalorder %s1446_s16, %s1165_s21  ;;  %p1174_p4 = scmp.lt.s32.totalorder %s1165_s21, %s1165_s21 }
  0x24   : > { %p1168_p3 = pnand %p1166_p0, %p1154_p6  ;;  %p1175_p10 = por %p1174_p4, %p1173_p8 }
  0x26   : > { %p1169_p9 = pneg %p1168_p3 }
  0x28   : > { %p1176_p7 = pnand %p1175_p10, %p1169_p9 }
  0x2a   : > { %1179 = shalt.err (!%p1176_p7)
}
  0x2b   : > { %s1710_s22 = smov 128   ;;  %s1711_s23 = smov 8  }
  0x2c   : > { %1062 = dma.hbm_to_vmem [thread:$0]  (!%p1453_p1), %s1695_s0, 512, %s1446_s16, [#allocation4], %s1710_s22, %s1710_s22, %s1711_s23  }
  0x2d   : > { %s1180_s21 = scalar_lea.hbm %s1696_s1, 2048 }
  0x2e   : > { %p1181_p3 = scmp.ne.s32.totalorder %s1696_s1, %s1180_s21  ;;  %p1187_p9 = scmp.lt.u32.totalorder %s1180_s21, %s1696_s1 }
  0x30   : > { %p1183_p7 = pnand %p1181_p3, %p1154_p6 }
  0x32   : > { %p1184_p8 = pneg %p1183_p7 }
  0x34   : > { %p1189_p11 = pnand %p1187_p9, %p1184_p8 }
  0x36   : > { %1192 = shalt.err (!%p1189_p11)
}
  0x37   : > { %s1193_s16 = scalar_lea.vmem %s1463_s19, 2048  ;;  %p1201_p4 = scmp.lt.s32.totalorder %s1463_s19, %s1463_s19 }
  0x38   : > { %p1194_p5 = scmp.ne.s32.totalorder %s1463_s19, %s1193_s16  ;;  %p1202_p10 = scmp.lt.s32.totalorder %s1193_s16, %s1193_s16 }
  0x3a   : > { %p1196_p13 = pnand %p1194_p5, %p1154_p6  ;;  %p1203_p3 = por %p1202_p10, %p1201_p4 }
  0x3c   : > { %p1197_p0 = pneg %p1196_p13 }
  0x3e   : > { %p1204_p7 = pnand %p1203_p3, %p1197_p0 }
  0x40   : > { %1207 = shalt.err (!%p1204_p7)
}
  0x41   : > { %1065 = dma.hbm_to_vmem [thread:$0]  (!%p1453_p1), %s1696_s1, 2048, %s1463_s19, [#allocation7], %s1710_s22, %s1710_s22, %s1711_s23  }
  0x42   : > { %s31_s12 = sadd.s32 1, %s1324_s28  ;;  %s280_s13 = sand.u32 1, %s1328_s29  }
  0x43   : > { %p32_p6 = scmp.ge.s32.totalorder %s31_s12, 3  ;;  %s282_s17 = sand.u32 1, %s1316_s26  }
  0x44   : > { %s820_s8 = sshll.u32 %s1324_s28, 7  ;;  %s819_s15 = sshll.u32 %s282_s17, 7 }
  0x45   : > { %s1741_s12 = smov (%p32_p6, %s31_s12), 0  ;;  %s1532_s21 = scalar_lea.hbm %s1700_s5, %s820_s8 }
  0x46   : > { %s148_s19 = ssub.s32 %s1324_s28, %s1741_s12  ;;  %s284_s16 = scalar_lea.vmem [#allocation8], %s819_s15 }
  0x47   : > { %p149_p1 = scmp.eq.s32.totalorder %s148_s19, 0  ;;  %s290_s24 = sshll.u32 %s284_s16, 4  ;;  %s1536_s24 = int_to_ptr.vmem [resolvable:$true] %s290_s24 }
  0x48   : > { %s1722_s9 = sadd.s32 1, %s1316_s26  ;;  %s1543_s23 = scalar_lea.sflag [#allocation4], %s280_s13 }
  0x49   : > { %s1541_s22 = scalar_select %p149_p1, %s1316_s26, %s1722_s9  }
  0x4a   : > { %s1208_s17 = scalar_lea.hbm %s1532_s21, 2048  ;;  %p1210_p9 = pneg %p1459_p2 }
  0x4b   : > { %p1209_p8 = scmp.ne.s32.totalorder %s1532_s21, %s1208_s17  ;;  %s1213_s15 = scalar_lea.hbm %s1700_s5, 6144 }
  0x4c   : > { %p1214_p13 = scmp.lt.u32.totalorder %s1532_s21, %s1700_s5  ;;  %p1215_p0 = scmp.lt.u32.totalorder %s1213_s15, %s1208_s17 }
  0x4d   : > { %p1211_p11 = pnand %p1210_p9, %p1209_p8  ;;  %p1217_p10 = scmp.lt.u32.totalorder %s1208_s17, %s1532_s21 }
  0x4e   : > { %p1216_p4 = por %p1215_p0, %p1214_p13 }
  0x4f   : > { %p1212_p5 = pneg %p1211_p11 }
  0x50   : > { %p1218_p3 = por %p1217_p10, %p1216_p4 }
  0x52   : > { %p1219_p7 = pnand %p1218_p3, %p1212_p5 }
  0x54   : > { %1222 = shalt.err (!%p1219_p7)
}
  0x55   : > { %s1223_s13 = scalar_lea.vmem %s1536_s24, 2048  ;;  %s1334_s16 = smov [#allocation8]  }
  0x56   : > { %p1224_p6 = scmp.ne.s32.totalorder %s1536_s24, %s1223_s13  ;;  %s1228_s9 = sshll.u32 %s1334_s16, 4  ;;  %s1229_s9 = int_to_ptr.vmem [resolvable:$false] %s1228_s9 }
  0x57   : > { %s1230_s8 = scalar_lea.vmem %s1229_s9, 4096  ;;  %p1231_p11 = scmp.lt.s32.totalorder %s1536_s24, %s1229_s9 }
  0x58   : > { %p1226_p1 = pnand %p1224_p6, %p1210_p9  ;;  %p1232_p13 = scmp.lt.s32.totalorder %s1230_s8, %s1223_s13 }
  0x5a   : > { %p1227_p8 = pneg %p1226_p1  ;;  %p1233_p0 = por %p1232_p13, %p1231_p11 }
  0x5c   : > { %p1234_p4 = pnand %p1233_p0, %p1227_p8 }
  0x5e   : > { %1237 = shalt.err (!%p1234_p4)
}
  0x5f   : > { %s1335_s17 = smov 384   ;;  %s1723_s10 = smov 8  }
  0x60   : > { %s1724_s15 = smov 128   ;;  %308 = sbr.rel (%p1442_p12) target bundleno = 970 (0x3ca), region = 48 }
  0x61   : > { %1069 = dma.hbm_to_vmem [thread:$0]  (!%p1459_p2), %s1532_s21, 2048, %s1536_s24, %s1543_s23, %s1335_s17, %s1724_s15, %s1723_s10  }
  0x62   : > { %p1725_p9 = scmp.eq.s32.totalorder (!%p1442_p12), %s1411_s30, 0 }
  0x67   : > { %1291 = dma.done.wait (%p1725_p9), [#allocation4], 512   ;;  %p1726_p5 = pmov %p1725_p9 }
  0x69   : > { %1293 = vsyncadd (%p1726_p5), [#allocation4], 4294966784  ;;  %p1727_p10 = pmov %p1726_p5 }
  0x6a   : > { %p1728_p3 = pmov %p1726_p5 }
  0x6b   : > { %1295 = dma.done.wait (%p1727_p10), [#allocation7], 2048  }
  0x6c   : > { %1297 = vsyncadd (%p1728_p3), [#allocation7], 4294965248  ;;  %s318_s20 = sand.u32 1, %s1411_s30   ;;  %s1585_s23 = sand.u32 1, %s1312_s25  }
  0x6d   : > { %s824_s14 = sshll.u32 %s1585_s23, 7  ;;  %s319_s21 = scalar_lea.sflag [#allocation4], %s318_s20 }
  0x6e   : > { %s1588_s24 = scalar_lea.vmem [#allocation8], %s824_s14  ;;  %p1729_p12 = scmp.ne.s32.totalorder %s1714_s11, 0 }
  0x70   : > { %1299 = dma.done.wait (%p1729_p12), %s319_s21, 2048  }
  0x71   : > { %1301 = vsyncadd (%p1729_p12), %s319_s21, 4294965248  ;;  %s825_s18 = sshll.u32 %s1585_s23, 5  ;;  %p357_p2 = scmp.lt.s32.totalorder %s1320_s27, 2 }
  0x72   : > { %s1603_s9 = scalar_lea.vmem [#allocation9], %s825_s18  ;;  %p826_p7 = scmp.ne.s32.totalorder %s1320_s27, 0 }
  0x73   : > { %s1597_s19 = scalar_select %p357_p2, %s1320_s27, 2 }
  0x74   : > { %364 = sbr.rel (%p826_p7) target bundleno = 704 (0x2c0), region = 64  ;;  %v369_v0 = vld [vmem:[#allocation6] sm:$0xff] (!%p826_p7)  ;;  %v370_v1 = vld [vmem:[#allocation6 + $0x8] sm:$0xff] (!%p826_p7)  ;;  %v371_v2 = vld [vmem:[#allocation6 + $0x10] sm:$0xff] (!%p826_p7) }
  0x75   : > { %s359_s16 = scalar_lea.vmem %s1701_s6, %s1597_s19  ;;  %v951_v3 = vpack.c.bf16 (!%p826_p7), %v370_v1, %v369_v0  ;;  %v372_v4 = vld [vmem:[#allocation6 + $0x18] sm:$0xff] (!%p826_p7)  ;;  %v373_v6 = vld [vmem:[#allocation6 + $0x20] sm:$0xff] (!%p826_p7)  ;;  %v374_v7 = vld [vmem:[#allocation6 + $0x28] sm:$0xff] (!%p826_p7) }
  0x76   : > { %v955_v5 = vpack.c.bf16 (!%p826_p7), %v372_v4, %v371_v2  ;;  %v959_v8 = vpack.c.bf16 (!%p826_p7), %v374_v7, %v373_v6  ;;  %v365_v9 = vld [vmem:[#allocation3] sm:$0xff] (!%p826_p7)  ;;  %v367_v10 = vld [vmem:[#allocation3 + $0x10] sm:$0xff] (!%p826_p7)  ;;  %v376_v12 = vld [vmem:[#allocation6 + $0x38] sm:$0xff] (!%p826_p7) }
  0x77   : > { %952 = vmatprep.subr.bf16.mxu0 (!%p826_p7), %v951_v3  ;;  %1015 = vmatprep.subr.bf16.mxu1 (!%p826_p7), %v951_v3  ;;  %v375_v11 = vld [vmem:[#allocation6 + $0x30] sm:$0xff] (!%p826_p7)  ;;  %v377_v14 = vld [vmem:[#allocation6 + $0x40] sm:$0xff] (!%p826_p7)  ;;  %v378_v15 = vld [vmem:[#allocation6 + $0x48] sm:$0xff] (!%p826_p7) }
  0x78   : > { %954 = vmatpush3.bf16.msra.mxu0 (!%p826_p7), %v951_v3  ;;  %1023 = vmatpush3.bf16.msra.mxu1 (!%p826_p7), %v951_v3  ;;  %v963_v13 = vpack.c.bf16 (!%p826_p7), %v376_v12, %v375_v11  ;;  %v967_v16 = vpack.c.bf16 (!%p826_p7), %v378_v15, %v377_v14  ;;  %v379_v17 = vld [vmem:[#allocation6 + $0x50] sm:$0xff] (!%p826_p7)  ;;  %v380_v18 = vld [vmem:[#allocation6 + $0x58] sm:$0xff] (!%p826_p7)  ;;  %v381_v20 = vld [vmem:[#allocation6 + $0x60] sm:$0xff] (!%p826_p7) }
  0x79   : > { %956 = vmatprep.subr.bf16.mxu0 (!%p826_p7), %v955_v5  ;;  %1016 = vmatprep.subr.bf16.mxu1 (!%p826_p7), %v955_v5  ;;  %v971_v19 = vpack.c.bf16 (!%p826_p7), %v380_v18, %v379_v17  ;;  %v382_v21 = vld [vmem:[#allocation6 + $0x68] sm:$0xff] (!%p826_p7)  ;;  %v383_v23 = vld [vmem:[#allocation6 + $0x70] sm:$0xff] (!%p826_p7)  ;;  %v384_v24 = vld [vmem:[#allocation6 + $0x78] sm:$0xff] (!%p826_p7) }
  0x7a   : > { %907 = vmatprep.mubr.f32.mxu0 (!%p826_p7), %v365_v9  ;;  %910 = vmatprep.mubr.f32.mxu1 (!%p826_p7), %v367_v10  ;;  %v975_v22 = vpack.c.bf16 (!%p826_p7), %v382_v21, %v381_v20  ;;  %v979_v25 = vpack.c.bf16 (!%p826_p7), %v384_v24, %v383_v23  ;;  %v366_v26 = vld [vmem:[#allocation3 + $0x8] sm:$0xff] (!%p826_p7)  ;;  %v368_v27 = vld [vmem:[#allocation3 + $0x18] sm:$0xff] (!%p826_p7)  ;;  %v827_v28 = vld [vmem:[%s1697_s2] ss:$0 sm:$0xff] (!%p826_p7) }
  0x7b   : > { %v829_v24 = vld [vmem:[%s1699_s4] ss:$0 sm:$0xff] }
  0x7c   : > { %958 = vmatpush3.bf16.msra.mxu0 %v955_v5  ;;  %1024 = vmatpush3.bf16.msra.mxu1 %v955_v5 }
  0x7d   : > { %960 = vmatprep.subr.bf16.mxu0 %v959_v8  ;;  %1017 = vmatprep.subr.bf16.mxu1 %v959_v8 }
  0x80   : > { %962 = vmatpush3.bf16.msra.mxu0 %v959_v8  ;;  %1025 = vmatpush3.bf16.msra.mxu1 %v959_v8 }
  0x81   : > { %964 = vmatprep.subr.bf16.mxu0 %v963_v13  ;;  %1018 = vmatprep.subr.bf16.mxu1 %v963_v13 }
  0x84   : > { %966 = vmatpush3.bf16.msra.mxu0 %v963_v13  ;;  %1026 = vmatpush3.bf16.msra.mxu1 %v963_v13 }
  0x85   : > { %968 = vmatprep.subr.bf16.mxu0 %v967_v16  ;;  %1019 = vmatprep.subr.bf16.mxu1 %v967_v16 }
  0x88   : > { %970 = vmatpush3.bf16.msra.mxu0 %v967_v16  ;;  %1027 = vmatpush3.bf16.msra.mxu1 %v967_v16 }
  0x89   : > { %972 = vmatprep.subr.bf16.mxu0 %v971_v19  ;;  %1020 = vmatprep.subr.bf16.mxu1 %v971_v19 }
  0x8c   : > { %974 = vmatpush3.bf16.msra.mxu0 %v971_v19  ;;  %1028 = vmatpush3.bf16.msra.mxu1 %v971_v19 }
  0x8d   : > { %976 = vmatprep.subr.bf16.mxu0 %v975_v22  ;;  %1021 = vmatprep.subr.bf16.mxu1 %v975_v22 }
  0x90   : > { %978 = vmatpush3.bf16.msra.mxu0 %v975_v22  ;;  %1029 = vmatpush3.bf16.msra.mxu1 %v975_v22  ;;  %v828_v22 = vld [vmem:[%s1698_s3] ss:$0 sm:$0xff] }
  0x91   : > { %980 = vmatprep.subr.bf16.mxu0 %v979_v25  ;;  %1022 = vmatprep.subr.bf16.mxu1 %v979_v25 }
  0x94   : > { %982 = vmatpush3.bf16.msra.mxu0 %v979_v25  ;;  %1030 = vmatpush3.bf16.msra.mxu1 %v979_v25 }
  0x97   : > { %908 = vmatmul.mubr.f32.vlgmr.msra.gmra.mrb[0].mxu0 %v366_v26  ;;  %911 = vmatmul.mubr.f32.vlgmr.msra.gmra.mrb[0].mxu1 %v368_v27 }
 0x16a   : > { %v909_v29 = vpop.f32.mrb[0].mxu0  ;;  %v912_v30 = vpop.f32.mrb[0].mxu1 }
 0x16b   : > { %v464_v31 = vadd.f32 %v909_v29, %v827_v28  ;;  %v474_v32 = vadd.f32 %v912_v30, %v827_v28  ;;  %v458_v33 = vpop.f32.mrb[1].mxu0  ;;  %v468_v34 = vpop.f32.mrb[1].mxu1 }
 0x16c   : > { %v459_v35 = vadd.f32 %v827_v28, %v458_v33  ;;  %v469_v36 = vadd.f32 %v827_v28, %v468_v34 }
 0x16d   : > { %v482_v37 = vmul.f32 0.70710677, %v464_v31  ;;  %v484_v38 = vmul.f32 0.70710677, %v474_v32  ;;  %v478_v53 = vmul.f32 0.5, %v464_v31  ;;  %v480_v54 = vmul.f32 0.5, %v474_v32 }
 0x16e   : > { %v481_v39 = vmul.f32 0.70710677, %v459_v35  ;;  %v483_v40 = vmul.f32 0.70710677, %v469_v36  ;;  %v477_v45 = vmul.f32 0.5, %v459_v35  ;;  %v479_v47 = vmul.f32 0.5, %v469_v36 }
 0x16f   : > { %1136 = verf.f32 %v482_v37 }
 0x170   : > { %1138 = verf.f32 %v484_v38 }
 0x171   : > { %1140 = verf.f32 %v481_v39 }
 0x172   : > { %1142 = verf.f32 %v483_v40 }
 0x179   : > { %v1137_v41 = vpop.eup %1136 }
 0x17a   : > { %v1139_v42 = vpop.eup %1138  ;;  %v490_v50 = vadd.f32 1.0, %v1137_v41 }
 0x17b   : > { %v1141_v43 = vpop.eup %1140  ;;  %v492_v52 = vadd.f32 1.0, %v1139_v42 }
 0x17c   : > { %v1143_v44 = vpop.eup %1142  ;;  %v489_v46 = vadd.f32 1.0, %v1141_v43  ;;  %v494_v55 = vmul.f32 %v490_v50, %v478_v53 }
 0x17d   : > { %v491_v48 = vadd.f32 1.0, %v1143_v44  ;;  %v496_v56 = vmul.f32 %v492_v52, %v480_v54 }
 0x17e   : > { %v493_v49 = vmul.f32 %v489_v46, %v477_v45 }
 0x17f   : > { %v495_v51 = vmul.f32 %v491_v48, %v479_v47 }
 0x180   : > { %497 = vadd.xlane.f32.xlu0 %v493_v49 }
 0x181   : > { %501 = vadd.xlane.f32.xlu1 %v495_v51 }
 0x184   : > { %499 = vadd.xlane.f32.xlu0 %v494_v55 }
 0x185   : > { %503 = vadd.xlane.f32.xlu1 %v496_v56 }
 0x20d   : > { %v498_v57 = vpop.xlane.xlu0 %497 }
 0x20e   : > { %v502_v58 = vpop.xlane.xlu1 %501  ;;  %v506_v59 = vmul.f32 0.0078125, %v498_v57 }
 0x20f   : > { %v508_v60 = vmul.f32 0.0078125, %v502_v58 }
 0x210   : > { %v510_v61 = vsub.f32 %v493_v49, %v506_v59 }
 0x211   : > { %v500_v62 = vpop.xlane.xlu0 %499  ;;  %v512_v63 = vsub.f32 %v495_v51, %v508_v60 }
 0x212   : > { %v504_v0 = vpop.xlane.xlu1 %503  ;;  %v507_v1 = vmul.f32 0.0078125, %v500_v62  ;;  %v514_v2 = vmul.f32 %v510_v61, %v510_v61 }
 0x213   : > { %v509_v3 = vmul.f32 0.0078125, %v504_v0  ;;  %v516_v6 = vmul.f32 %v512_v63, %v512_v63 }
 0x214   : > { %v511_v4 = vsub.f32 %v494_v55, %v507_v1  ;;  %518 = vadd.xlane.f32.xlu0 %v514_v2 }
 0x215   : > { %v513_v5 = vsub.f32 %v496_v56, %v509_v3 }
 0x216   : > { %v515_v7 = vmul.f32 %v511_v4, %v511_v4 }
 0x217   : > { %v517_v8 = vmul.f32 %v513_v5, %v513_v5 }
 0x218   : > { %522 = vadd.xlane.f32.xlu0 %v516_v6  ;;  %520 = vadd.xlane.f32.xlu1 %v515_v7 }
 0x21c   : > { %524 = vadd.xlane.f32.xlu1 %v517_v8 }
 0x2a1   : > { %v519_v9 = vpop.xlane.xlu0 %518 }
 0x2a2   : > { %v526_v10 = vmul.f32 0.0078125, %v519_v9 }
 0x2a4   : > { %v530_v11 = vadd.f32 1e-05, %v526_v10 }
 0x2a5   : > { %v521_v12 = vpop.xlane.xlu1 %520  ;;  %v523_v13 = vpop.xlane.xlu0 %522 }
 0x2a6   : > { %1144 = vrsqrt.f32 %v530_v11  ;;  %v527_v14 = vmul.f32 0.0078125, %v521_v12  ;;  %v528_v15 = vmul.f32 0.0078125, %v523_v13 }
 0x2a8   : > { %v531_v16 = vadd.f32 1e-05, %v527_v14  ;;  %v532_v17 = vadd.f32 1e-05, %v528_v15 }
 0x2a9   : > { %v525_v18 = vpop.xlane.xlu1 %524 }
 0x2aa   : > { %1146 = vrsqrt.f32 %v531_v16  ;;  %v529_v19 = vmul.f32 0.0078125, %v525_v18 }
 0x2ab   : > { %1148 = vrsqrt.f32 %v532_v17 }
 0x2ac   : > { %v533_v20 = vadd.f32 1e-05, %v529_v19 }
 0x2ae   : > { %1150 = vrsqrt.f32 %v533_v20 }
 0x2b0   : > { %v1145_v21 = vpop.eup %1144 }
 0x2b1   : > { %v538_v23 = vmul.f32 %v1145_v21, %v510_v61 }
 0x2b3   : > { %v549_v25 = vmul.f32 %v828_v22, %v538_v23 }
 0x2b4   : > { %v1147_v26 = vpop.eup %1146 }
 0x2b5   : > { %v1149_v27 = vpop.eup %1148  ;;  %v560_v28 = vadd.f32 %v829_v24, %v549_v25  ;;  %v539_v29 = vmul.f32 %v1147_v26, %v511_v4 }
 0x2b6   : > { %v540_v30 = vmul.f32 %v1149_v27, %v512_v63 }
 0x2b7   : > { %564 = vst [vmem:[#allocation2] sm:$0xff] %v560_v28  ;;  %v550_v31 = vmul.f32 %v828_v22, %v539_v29 }
 0x2b8   : > { %v1151_v32 = vpop.eup %1150  ;;  %v551_v33 = vmul.f32 %v828_v22, %v540_v30 }
 0x2b9   : > { %v561_v34 = vadd.f32 %v829_v24, %v550_v31  ;;  %v541_v35 = vmul.f32 %v1151_v32, %v513_v5 }
 0x2ba   : > { %v562_v36 = vadd.f32 %v829_v24, %v551_v33 }
 0x2bb   : > { %565 = vst [vmem:[#allocation2 + $0x8] sm:$0xff] %v561_v34  ;;  %v552_v37 = vmul.f32 %v828_v22, %v541_v35 }
 0x2bc   : > { %566 = vst [vmem:[#allocation2 + $0x10] sm:$0xff] %v562_v36 }
 0x2bd   : > { %v563_v38 = vadd.f32 %v829_v24, %v552_v37 }
 0x2bf   : > { %567 = vst [vmem:[#allocation2 + $0x18] sm:$0xff] %v563_v38 }
 0x2c0 PF: > { %v572_v39 = vld [vmem:[%s1588_s24] sm:$0xff]  ;;  %v573_v40 = vld [vmem:[%s1588_s24 + $0x8] sm:$0xff]  ;;  %v574_v41 = vld [vmem:[%s1588_s24 + $0x10] sm:$0xff]  ;;  %s832_s14 = sshll.u32 %s1320_s27, 7  ;;  %s700_s18 = sshll.u32 %s1603_s9, 4  ;;  %s1643_s18 = int_to_ptr.vmem [resolvable:$true] %s700_s18 }
 0x2c1   : > { %v983_v42 = vpack.c.bf16 %v573_v40, %v572_v39  ;;  %v575_v43 = vld [vmem:[%s1588_s24 + $0x18] sm:$0xff]  ;;  %v576_v45 = vld [vmem:[%s1588_s24 + $0x20] sm:$0xff]  ;;  %v577_v46 = vld [vmem:[%s1588_s24 + $0x28] sm:$0xff]  ;;  %s1730_s11 = sld [smem:[#allocation15_spill]]  ;;  %s1641_s8 = scalar_lea.hbm %s1702_s7, %s832_s14 }
 0x2c2   : > { %v987_v44 = vpack.c.bf16 %v575_v43, %v574_v41  ;;  %v991_v47 = vpack.c.bf16 %v577_v46, %v576_v45  ;;  %v568_v48 = vld [vmem:[#allocation2] sm:$0xff]  ;;  %v578_v50 = vld [vmem:[%s1588_s24 + $0x30] sm:$0xff]  ;;  %v579_v51 = vld [vmem:[%s1588_s24 + $0x38] sm:$0xff]  ;;  %s685_s27 = scalar_lea.sflag [#allocation5], %s1585_s23  ;;  %s1238_s19 = scalar_lea.vmem %s1643_s18, 512 }
 0x2c3   : > { %984 = vmatprep.subr.bf16.mxu0 %v983_v42  ;;  %1031 = vmatprep.subr.bf16.mxu1 %v983_v42  ;;  %v570_v49 = vld [vmem:[#allocation2 + $0x10] sm:$0xff]  ;;  %v995_v52 = vpack.c.bf16 %v579_v51, %v578_v50  ;;  %v580_v53 = vld [vmem:[%s1588_s24 + $0x40] sm:$0xff]  ;;  %v581_v54 = vld [vmem:[%s1588_s24 + $0x48] sm:$0xff]  ;;  %p1239_p6 = scmp.ne.s32.totalorder %s1643_s18, %s1238_s19 }
 0x2c4   : > { %986 = vmatpush3.bf16.msra.mxu0 %v983_v42  ;;  %1039 = vmatpush3.bf16.msra.mxu1 %v983_v42  ;;  %v999_v55 = vpack.c.bf16 %v581_v54, %v580_v53  ;;  %v582_v56 = vld [vmem:[%s1588_s24 + $0x50] sm:$0xff]  ;;  %v583_v57 = vld [vmem:[%s1588_s24 + $0x58] sm:$0xff]  ;;  %v584_v59 = vld [vmem:[%s1588_s24 + $0x60] sm:$0xff] }
 0x2c5   : > { %988 = vmatprep.subr.bf16.mxu0 %v987_v44  ;;  %1032 = vmatprep.subr.bf16.mxu1 %v987_v44  ;;  %v1003_v58 = vpack.c.bf16 %v583_v57, %v582_v56  ;;  %v585_v60 = vld [vmem:[%s1588_s24 + $0x68] sm:$0xff]  ;;  %v586_v62 = vld [vmem:[%s1588_s24 + $0x70] sm:$0xff]  ;;  %v587_v63 = vld [vmem:[%s1588_s24 + $0x78] sm:$0xff] }
 0x2c6   : > { %945 = vmatprep.mubr.f32.mxu0 %v568_v48  ;;  %948 = vmatprep.mubr.f32.mxu1 %v570_v49  ;;  %v1007_v61 = vpack.c.bf16 %v585_v60, %v584_v59  ;;  %v1011_v0 = vpack.c.bf16 %v587_v63, %v586_v62  ;;  %v569_v1 = vld [vmem:[#allocation2 + $0x8] sm:$0xff]  ;;  %v571_v2 = vld [vmem:[#allocation2 + $0x18] sm:$0xff]  ;;  %v830_v3 = vld [vmem:[%s359_s16] ss:$0 sm:$0xff]  ;;  %s1336_s16 = smov [#allocation9]  }
 0x2c7   : > { %p1731_p1 = scmp.ne.s32.totalorder %s1730_s11, 0  ;;  %s1242_s17 = sshll.u32 %s1336_s16, 4  ;;  %s1243_s17 = int_to_ptr.vmem [resolvable:$false] %s1242_s17 }
 0x2c8   : > { %990 = vmatpush3.bf16.msra.mxu0 %v987_v44  ;;  %1040 = vmatpush3.bf16.msra.mxu1 %v987_v44  ;;  %s1244_s10 = scalar_lea.vmem %s1243_s17, 1024  ;;  %p1245_p13 = scmp.lt.s32.totalorder %s1643_s18, %s1243_s17 }
 0x2c9   : > { %992 = vmatprep.subr.bf16.mxu0 %v991_v47  ;;  %1033 = vmatprep.subr.bf16.mxu1 %v991_v47  ;;  %p1240_p8 = pnand %p1239_p6, %p1731_p1  ;;  %p1246_p0 = scmp.lt.s32.totalorder %s1244_s10, %s1238_s19 }
 0x2cb   : > { %p1241_p11 = pneg %p1240_p8  ;;  %p1247_p4 = por %p1246_p0, %p1245_p13 }
 0x2cc   : > { %994 = vmatpush3.bf16.msra.mxu0 %v991_v47  ;;  %1041 = vmatpush3.bf16.msra.mxu1 %v991_v47 }
 0x2cd   : > { %996 = vmatprep.subr.bf16.mxu0 %v995_v52  ;;  %1034 = vmatprep.subr.bf16.mxu1 %v995_v52  ;;  %p1248_p9 = pnand %p1247_p4, %p1241_p11 }
 0x2d0   : > { %998 = vmatpush3.bf16.msra.mxu0 %v995_v52  ;;  %1042 = vmatpush3.bf16.msra.mxu1 %v995_v52 }
 0x2d1   : > { %1000 = vmatprep.subr.bf16.mxu0 %v999_v55  ;;  %1035 = vmatprep.subr.bf16.mxu1 %v999_v55 }
 0x2d4   : > { %1002 = vmatpush3.bf16.msra.mxu0 %v999_v55  ;;  %1043 = vmatpush3.bf16.msra.mxu1 %v999_v55 }
 0x2d5   : > { %1004 = vmatprep.subr.bf16.mxu0 %v1003_v58  ;;  %1036 = vmatprep.subr.bf16.mxu1 %v1003_v58 }
 0x2d8   : > { %1006 = vmatpush3.bf16.msra.mxu0 %v1003_v58  ;;  %1044 = vmatpush3.bf16.msra.mxu1 %v1003_v58 }
 0x2d9   : > { %1008 = vmatprep.subr.bf16.mxu0 %v1007_v61  ;;  %1037 = vmatprep.subr.bf16.mxu1 %v1007_v61 }
 0x2dc   : > { %1010 = vmatpush3.bf16.msra.mxu0 %v1007_v61  ;;  %1045 = vmatpush3.bf16.msra.mxu1 %v1007_v61 }
 0x2dd   : > { %1012 = vmatprep.subr.bf16.mxu0 %v1011_v0  ;;  %1038 = vmatprep.subr.bf16.mxu1 %v1011_v0 }
 0x2e0   : > { %1014 = vmatpush3.bf16.msra.mxu0 %v1011_v0  ;;  %1046 = vmatpush3.bf16.msra.mxu1 %v1011_v0 }
 0x2e3   : > { %946 = vmatmul.mubr.f32.vlgmr.msra.gmra.mrb[0].mxu0 %v569_v1  ;;  %949 = vmatmul.mubr.f32.vlgmr.msra.gmra.mrb[0].mxu1 %v571_v2 }
 0x3b6   : > { %v947_v4 = vpop.f32.mrb[0].mxu0  ;;  %v950_v5 = vpop.f32.mrb[0].mxu1 }
 0x3b7   : > { %v667_v6 = vadd.f32 %v947_v4, %v830_v3  ;;  %v677_v7 = vadd.f32 %v950_v5, %v830_v3  ;;  %v661_v8 = vpop.f32.mrb[1].mxu0  ;;  %v671_v9 = vpop.f32.mrb[1].mxu1 }
 0x3b8   : > { %v662_v10 = vadd.f32 %v830_v3, %v661_v8  ;;  %v672_v11 = vadd.f32 %v830_v3, %v671_v9 }
 0x3b9   : > { %681 = vst [vmem:[%s1603_s9 + $0x8] sm:$0xff] %v667_v6  ;;  %683 = vst [vmem:[%s1603_s9 + $0x18] sm:$0xff] %v677_v7 }
 0x3ba   : > { %680 = vst [vmem:[%s1603_s9] sm:$0xff] %v662_v10  ;;  %682 = vst [vmem:[%s1603_s9 + $0x10] sm:$0xff] %v672_v11 }
 0x3bb   : > { %1251 = shalt.err (!%p1248_p9)
}
 0x3bc   : > { %s1252_s9 = scalar_lea.hbm %s1641_s8, 512  ;;  %s1256_s14 = scalar_lea.hbm %s1702_s7, 1536 }
 0x3bd   : > { %p1253_p5 = scmp.ne.s32.totalorder %s1641_s8, %s1252_s9  ;;  %p1257_p12 = scmp.lt.u32.totalorder %s1641_s8, %s1702_s7 }
 0x3be   : > { %p1258_p2 = scmp.lt.u32.totalorder %s1256_s14, %s1252_s9  ;;  %p1260_p6 = scmp.lt.u32.totalorder %s1252_s9, %s1641_s8 }
 0x3bf   : > { %p1254_p10 = pnand %p1253_p5, %p1731_p1 }
 0x3c0   : > { %p1259_p7 = por %p1258_p2, %p1257_p12 }
 0x3c1   : > { %p1255_p3 = pneg %p1254_p10 }
 0x3c2   : > { %p1261_p8 = por %p1260_p6, %p1259_p7 }
 0x3c4   : > { %p1262_p11 = pnand %p1261_p8, %p1255_p3 }
 0x3c6   : > { %1265 = shalt.err (!%p1262_p11)
}
 0x3c7   : > { %s1337_s30 = smov 128   ;;  %s1338_s13 = smov 384  }
 0x3c8   : > { %s1339_s19 = smov 8  }
 0x3c9   : > { %1057 = dma.vmem_to_hbm [thread:$0]  (%p1731_p1), %s1643_s18, 512, %s1641_s8, %s685_s27, %s1337_s30, %s1338_s13, %s1339_s19  }
 0x3ca PF: > { %s1732_s16 = sld [smem:[#allocation14_spill]]  ;;  %s1733_s17 = sld [smem:[#allocation16_spill]] }
 0x3cb   : > { %p1079_p13 = scmp.ge.s32.totalorder %s1328_s29, 2 }
 0x3d0   : > { %s715_s10 = sand.u32 1, %s1732_s16   ;;  %p1734_p0 = scmp.ne.s32.totalorder %s1733_s17, 0 }
 0x3d1   : > { %s716_s9 = scalar_lea.sflag [#allocation5], %s715_s10 }
 0x3d2   : > { %p1071_p4 = pnand %p1079_p13, %p1734_p0 }
 0x3d4   : > { %1303 = dma.done.wait (!%p1071_p4), %s716_s9, 512  }
 0x3d5   : > { %1305 = vsyncadd (!%p1071_p4), %s716_s9, 4294966784  ;;  %s22_s29 = sadd.s32 1, %s1328_s29   ;;  %s1735_s24 = smov %s1312_s25 }
 0x3d6   : > { %p19_p9 = scmp.ge.s32.totalorder %s22_s29, 5   ;;  %s1736_s25 = smov %s1316_s26 }
 0x3d7   : > { %s1737_s26 = smov %s1541_s22  ;;  %s1738_s27 = smov %s1324_s28 }
 0x3d8   : > { %s1739_s28 = smov %s1741_s12  ;;  %21 = sbr.rel (!%p19_p9) target bundleno = 6 (0x6), region = 108 }
 0x3df   :  { %721 = vsyncpa [#allocation4], 1 }
 0x3e0   :  { %723 = vsyncpa [#allocation4 + $0x1], 1 }
 0x3e1   :  { %724 = vsyncpa [#allocation7], 1 }
 0x3e2   :  { %725 = vsyncpa [#allocation5], 1 }
 0x3e3   :  { %727 = vsyncpa [#allocation5 + $0x1], 1 }

</bundles_post_ra>
